<compile_context>
chip_gen: v6e
topology: v6e:2x2x1
jax: 0.10.0
libtpu: 0.0.40
codegen_flags: <defaults>
</compile_context>

<pallas_src>
import math
import numpy as np

import jax
import jax.numpy as jnp
from jax import lax
from jax.experimental import pallas as pl
from jax.experimental.pallas import tpu as pltpu


W_DTYPE = jnp.bfloat16                  # storage dtype of matmul weights
VMEM_LIMIT = 32 * 1024 * 1024           # explicit scoped-VMEM limit per kernel


# ----------------------------------------------------------------------------
# Small helpers
# ----------------------------------------------------------------------------
def _resident(arr):
    """Full-array BlockSpec that ignores the grid index (weights / small consts)."""
    nd = arr.ndim
    return pl.BlockSpec(arr.shape, lambda *_: (0,) * nd)


def _sigmoid(y):
    # exact reciprocal (approx=False) so outputs match the reference sigmoid closely
    return pl.reciprocal(1.0 + jnp.exp(-y), approx=False)


# ----------------------------------------------------------------------------
# Fused TemporalConvNet chain kernel — whole batch on lanes, merged groups
# ----------------------------------------------------------------------------
def _causal_shift(x, s, T, t_in_seq):
    """out[:, b*T + t] = x[:, b*T + t - s] for t >= s, zeros for t < s (per sequence)."""
    if s == 0:
        return x
    if s >= T:
        return jnp.zeros_like(x)
    rolled = pltpu.roll(x, shift=s, axis=1)
    return jnp.where(t_in_seq >= s, rolled, 0.0)


def _conv_relu(x, w_ref, b_ref, K, dilation, T, t_in_seq):
    """Dilated causal grouped conv + ReLU as ONE matmul.
    x: (cin, B*T) f32; w_ref: block-diagonal (cout, K*cin) bf16; b_ref: (cout, 1) f32."""
    xs = jnp.concatenate(
        [_causal_shift(x, (K - 1 - k) * dilation, T, t_in_seq) for k in range(K)],
        axis=0)                                               # (K*cin, B*T)
    h = jnp.dot(w_ref[...], xs.astype(jnp.bfloat16),
                preferred_element_type=jnp.float32)
    return jnp.maximum(h + b_ref[...], 0.0)


def _temporal_block(x, w1, b1, w2, b2, ds, K, dilation, T, t_in_seq):
    h1 = _conv_relu(x, w1, b1, K, dilation, T, t_in_seq)
    h2 = _conv_relu(h1, w2, b2, K, dilation, T, t_in_seq)
    if ds is None:                                            # cin == cout
        res = x
    else:                                                     # 1x1 ungrouped downsample
        wd_ref, bd_ref = ds
        res = jnp.dot(wd_ref[...], x.astype(jnp.bfloat16),
                      preferred_element_type=jnp.float32) + bd_ref[...]
    return jnp.maximum(h2 + res, 0.0)


def make_tcn_chain_kernel(cfgs, T, with_head):
    """Whole TemporalConvNet (list of TemporalBlocks) in one kernel; optionally a
    fused Conv1d(C,1,1)+Sigmoid head (start/end branches)."""
    def kernel(*refs):
        x_ref, out_ref = refs[0], refs[-1]
        BT = x_ref.shape[-1]
        lane = lax.broadcasted_iota(jnp.int32, (1, BT), 1)
        t_in_seq = lane % T                                   # time index within each sequence
        x = x_ref[...]
        pos = 1
        for c in cfgs:
            w1, b1, w2, b2 = refs[pos:pos + 4]
            pos += 4
            ds = None
            if c["has_ds"]:
                ds = (refs[pos], refs[pos + 1])
                pos += 2
            x = _temporal_block(x, w1, b1, w2, b2, ds, c["K"], c["dilation"], T, t_in_seq)
        if with_head:
            wh_ref, bh_ref = refs[pos], refs[pos + 1]         # (1, C) bf16, (1, 1)
            y = jnp.dot(wh_ref[...], x.astype(jnp.bfloat16),
                        preferred_element_type=jnp.float32) + bh_ref[...]
            out_ref[...] = _sigmoid(y)                        # (1, B*T)
        else:
            out_ref[...] = x                                  # (cout, B*T)
    return kernel


def tcn_chain_forward(x_bt, blocks, T, head=None):
    """x_bt: (cin0, B*T).  Returns (cout, B*T) or (1, B*T) if head is given.
    At real scale, tile the B*T lane axis in multiples of T and mark it 'parallel'."""
    cin0, BT = x_bt.shape
    cfgs = [dict(K=b["K"], dilation=b["dilation"], has_ds=("wd" in b)) for b in blocks]
    args = [x_bt]
    in_specs = [_resident(x_bt)]
    for b in blocks:
        for name in ("w1", "b1", "w2", "b2"):
            args.append(b[name]); in_specs.append(_resident(b[name]))
        if "wd" in b:
            args += [b["wd"], b["bd"]]
            in_specs += [_resident(b["wd"]), _resident(b["bd"])]
    if head is not None:
        wh, bh = head
        args += [wh, bh]
        in_specs += [_resident(wh), _resident(bh)]
        out_shape = jax.ShapeDtypeStruct((1, BT), jnp.float32)
    else:
        out_shape = jax.ShapeDtypeStruct((blocks[-1]["cout"], BT), jnp.float32)
    return pl.pallas_call(
        make_tcn_chain_kernel(cfgs, T, with_head=head is not None),
        out_shape=out_shape,
        grid=(1,),
        in_specs=in_specs,
        out_specs=pl.BlockSpec(out_shape.shape, lambda i: (0, 0)),
        compiler_params=pltpu.CompilerParams(
            dimension_semantics=("arbitrary",),
            vmem_limit_bytes=VMEM_LIMIT),
    )(*args)


# ----------------------------------------------------------------------------
# Boundary-matching + Conv3d(N,1,1)+ReLU + first 1x1 Conv2d+ReLU, fused.
# Contraction reordered: P = w3d_stacked @ conf (channel contraction) first, then one
# big (H3d, N*T) @ (N*T, s_tile) matmul against the pre-stacked mask tile.
# ----------------------------------------------------------------------------
def make_bm_kernel(N, H3d):
    def kernel(conf_ref, mask_ref, w3d_ref, b3d_ref, w1_ref, b1_ref, out_ref):
        conf = conf_ref[...].astype(jnp.bfloat16)                               # (C, T)
        p_stk = jnp.dot(w3d_ref[...], conf,
                        preferred_element_type=jnp.float32)                     # (N*H3d, T)
        # in-VMEM relayout (N*H3d, T) -> (H3d, N*T): lane-concat of the N sublane blocks
        p_r = jnp.concatenate([p_stk[n * H3d:(n + 1) * H3d, :] for n in range(N)],
                              axis=1)                                            # (H3d, N*T)
        bm = jnp.dot(p_r.astype(jnp.bfloat16), mask_ref[...],
                     preferred_element_type=jnp.float32)                         # (H3d, s_tile)
        bm = jnp.maximum(bm + b3d_ref[...], 0.0)                                 # Conv3d + ReLU
        h = jnp.dot(w1_ref[...], bm.astype(jnp.bfloat16),
                    preferred_element_type=jnp.float32) + b1_ref[...]
        out_ref[...] = jnp.maximum(h, 0.0)                                       # 1x1 + ReLU
    return kernel


def bm_conv3d_1x1_forward(conf, params, cfg, T):
    B, C, _ = conf.shape
    N, H3d, H2d = cfg["num_sample"], cfg["hidden_3d"], cfg["hidden_2d"]
    mask = params["sample_mask"]                                 # (N*T, T*T) bf16
    NT, TT = mask.shape
    s_tile = cfg["s_tile"]
    # TODO(synk): pad the T*T spatial axis (and the mask) when tscale**2 % s_tile != 0.
    assert TT % s_tile == 0
    n_sp = TT // s_tile
    return pl.pallas_call(
        make_bm_kernel(N, H3d),
        out_shape=jax.ShapeDtypeStruct((B, H2d, TT), jnp.float32),
        grid=(n_sp, B),                 # spatial tile slow axis -> mask DMA'd n_sp times only
        in_specs=[
            pl.BlockSpec((None, C, T), lambda j, b: (b, 0, 0)),
            pl.BlockSpec((NT, s_tile), lambda j, b: (0, j)),
            _resident(params["w3d"]),
            _resident(params["b3d"]),
            _resident(params["w2d1"]),
            _resident(params["b2d1"]),
        ],
        out_specs=pl.BlockSpec((None, H2d, s_tile), lambda j, b: (b, 0, j)),
        compiler_params=pltpu.CompilerParams(
            dimension_semantics=("parallel", "parallel"),
            vmem_limit_bytes=VMEM_LIMIT),
    )(conf, mask, params["w3d"], params["b3d"], params["w2d1"], params["b2d1"])


# ----------------------------------------------------------------------------
# Fused Conv2d chain (after the fused 1x1): 3x3+ReLU -> 3x3+ReLU -> 1x1+Sigmoid
# 3x3 convs are 9 shifted matmuls on the T*T-flattened lanes; the 9 edge masks are
# built once and reused by both layers.
# ----------------------------------------------------------------------------
def make_conv2d_chain_kernel(T, TT):
    def kernel(x_ref, w2_ref, b2_ref, w3_ref, b3_ref, w4_ref, b4_ref, out_ref):
        lane = lax.broadcasted_iota(jnp.int32, (1, TT), 1)
        wpos = lane % T
        shifts, masks = [], []
        for k in range(9):
            ky, kx = divmod(k, 3)
            o = (ky - 1) * T + (kx - 1)                       # flat offset of this tap
            cond = None
            if o > 0:
                cond = lane < (TT - o)                        # below bottom edge -> 0
            elif o < 0:
                cond = lane >= (-o)                           # above top edge -> 0
            if kx == 0:                                       # left edge (row wrap) -> 0
                c2 = wpos != 0
                cond = c2 if cond is None else jnp.logical_and(cond, c2)
            elif kx == 2:                                     # right edge (row wrap) -> 0
                c2 = wpos != (T - 1)
                cond = c2 if cond is None else jnp.logical_and(cond, c2)
            shifts.append((-o) % TT)
            masks.append(None if cond is None else cond.astype(jnp.float32))

        def conv3x3(xin, w_ref, b_ref):
            acc = None
            for k in range(9):
                sh = xin if shifts[k] == 0 else pltpu.roll(xin, shift=shifts[k], axis=1)
                if masks[k] is not None:
                    sh = sh * masks[k]
                t = jnp.dot(w_ref[k], sh.astype(jnp.bfloat16),
                            preferred_element_type=jnp.float32)
                acc = t if acc is None else acc + t
            return jnp.maximum(acc + b_ref[...], 0.0)

        h = x_ref[...]                                        # (H2d, TT) — 1x1 already applied
        h = conv3x3(h, w2_ref, b2_ref)
        h = conv3x3(h, w3_ref, b3_ref)
        y = jnp.dot(w4_ref[...], h.astype(jnp.bfloat16),
                    preferred_element_type=jnp.float32) + b4_ref[...]
        out_ref[...] = _sigmoid(y)                            # (2, TT)
    return kernel


def conv2d_chain_forward(h, params, T):
    B, H2d, TT = h.shape
    names = ("w2d2", "b2d2", "w2d3", "b2d3", "w2d4", "b2d4")
    return pl.pallas_call(
        make_conv2d_chain_kernel(T, TT),
        out_shape=jax.ShapeDtypeStruct((B, 2, TT), jnp.float32),
        grid=(B,),
        in_specs=[pl.BlockSpec((None, H2d, TT), lambda b: (b, 0, 0))]
                 + [_resident(params[n]) for n in names],
        out_specs=pl.BlockSpec((None, 2, TT), lambda b: (b, 0, 0)),
        compiler_params=pltpu.CompilerParams(
            dimension_semantics=("parallel",),
            vmem_limit_bytes=VMEM_LIMIT),
    )(h, *[params[n] for n in names])


# ----------------------------------------------------------------------------
# shared_weight head: Linear -> ReLU -> MaxPool1d(T) -> Linear -> ReLU -> Linear
# Teachers x batch are batched on the lane axis; the big first Linear is tiled over
# its output dim; the (F, M) product is computed ONCE into a VMEM scratch.
# ----------------------------------------------------------------------------
def make_shared_weight_kernel(T, npt, num_tiles):
    def kernel(t_ref, s_ref, w1_ref, b1_ref, w2_ref, b2_ref, w3_ref, b3_ref,
               out_ref, prod_ref, pooled_ref):
        j = pl.program_id(0)

        @pl.when(j == 0)
        def _():                                              # hoisted out of the tile loop
            prod_ref[...] = (t_ref[...] * s_ref[...]).astype(prod_ref.dtype)

        h = jnp.dot(w1_ref[...], prod_ref[...],
                    preferred_element_type=jnp.float32) + b1_ref[...]   # (h1_tile, M)
        h = jnp.maximum(h, 0.0)
        M = h.shape[1]
        pooled_ref[j] = jnp.max(h.reshape(npt, T, M), axis=1)           # MaxPool1d(T, T)

        @pl.when(j == num_tiles - 1)
        def _():
            pall = pooled_ref[...].reshape(num_tiles * npt, M)          # (C/4, M)
            h2 = jnp.maximum(
                jnp.dot(w2_ref[...], pall, preferred_element_type=jnp.float32)
                + b2_ref[...], 0.0)                                     # (C/8, M)
            out_ref[...] = jnp.dot(w3_ref[...], h2,
                                   preferred_element_type=jnp.float32) + b3_ref[...]
    return kernel


def shared_weight_forward(teacher_t, student_t, params, cfg):
    F, M = teacher_t.shape
    T = cfg["tscale"]
    H1 = params["w_sw1"].shape[0]
    h1_tile = cfg["h1_tile"]
    # pooling windows (size T) must align with tile boundaries
    assert h1_tile % T == 0 and H1 % h1_tile == 0
    num_tiles = H1 // h1_tile
    npt = h1_tile // T
    return pl.pallas_call(
        make_shared_weight_kernel(T, npt, num_tiles),
        out_shape=jax.ShapeDtypeStruct((1, M), jnp.float32),
        grid=(num_tiles,),
        in_specs=[
            _resident(teacher_t),
            _resident(student_t),
            pl.BlockSpec((h1_tile, F), lambda j: (j, 0)),
            pl.BlockSpec((h1_tile, 1), lambda j: (j, 0)),
            _resident(params["w_sw2"]),
            _resident(params["b_sw2"]),
            _resident(params["w_sw3"]),
            _resident(params["b_sw3"]),
        ],
        out_specs=pl.BlockSpec((1, M), lambda j: (0, 0)),
        scratch_shapes=[pltpu.VMEM((F, M), jnp.bfloat16),               # product (computed once)
                        pltpu.VMEM((num_tiles, npt, M), jnp.float32)],  # pooled maxima
        compiler_params=pltpu.CompilerParams(
            dimension_semantics=("arbitrary",),
            vmem_limit_bytes=VMEM_LIMIT),
    )(teacher_t, student_t, params["w_sw1"], params["b_sw1"],
      params["w_sw2"], params["b_sw2"], params["w_sw3"], params["b_sw3"])


# ----------------------------------------------------------------------------
# Glue: boundary-matching sample mask and parameter init
# ----------------------------------------------------------------------------
def get_interp1d_bin_mask(seg_xmin, seg_xmax, tscale, num_sample, num_sample_perbin):
    plen = float(seg_xmax - seg_xmin)
    plen_sample = plen / (num_sample * num_sample_perbin - 1.0)
    total_samples = [seg_xmin + plen_sample * ii
                     for ii in range(num_sample * num_sample_perbin)]
    p_mask = []
    for idx in range(num_sample):
        bin_samples = total_samples[idx * num_sample_perbin:(idx + 1) * num_sample_perbin]
        bin_vector = np.zeros([tscale])
        for sample in bin_samples:
            sample_upper = math.ceil(sample)
            sample_decimal, sample_down = math.modf(sample)
            if 0 <= int(sample_down) <= tscale - 1:
                bin_vector[int(sample_down)] += 1 - sample_decimal
            if 0 <= int(sample_upper) <= tscale - 1:
                bin_vector[int(sample_upper)] += sample_decimal
        p_mask.append(bin_vector / num_sample_perbin)
    return np.stack(p_mask, axis=1)


def get_interp1d_mask(tscale, prop_boundary_ratio, num_sample, num_sample_perbin):
    mask_mat = []
    for end_index in range(tscale):
        mask_mat_vector = []
        for start_index in range(tscale):
            if start_index <= end_index:
                p_xmin = start_index
                p_xmax = end_index + 1
                center_len = float(p_xmax - p_xmin) + 1
                sample_xmin = p_xmin - center_len * prop_boundary_ratio
                sample_xmax = p_xmax + center_len * prop_boundary_ratio
                p_mask = get_interp1d_bin_mask(sample_xmin, sample_xmax, tscale,
                                               num_sample, num_sample_perbin)
            else:
                p_mask = np.zeros([tscale, num_sample])
            mask_mat_vector.append(p_mask)
        mask_mat.append(np.stack(mask_mat_vector, axis=2))
    mask_mat = np.stack(mask_mat, axis=3).astype(np.float32)   # (T_time, N, T_start, T_end)
    TT = tscale * tscale
    # pre-stacked contraction layout: row = n*T + t_time, column = start*T + end
    m = mask_mat.transpose(1, 0, 2, 3).reshape(num_sample * tscale, TT)
    return jnp.asarray(m)


def init_conv_blockdiag(key, cout, cin, K, G):
    """weight_norm'd grouped Conv1d, merged into a single block-diagonal (cout, K*cin)
    weight with the K taps stacked k-major along the contraction axis."""
    cin_pg, cout_pg = cin // G, cout // G
    kv, kg, kb = jax.random.split(key, 3)
    v = jax.random.normal(kv, (cout, cin_pg, K), jnp.float32) * 0.05
    gsc = jax.random.uniform(kg, (cout, 1, 1), jnp.float32, minval=0.5, maxval=1.5)
    w = gsc * v / (jnp.sqrt(jnp.sum(v * v, axis=(1, 2), keepdims=True)) + 1e-12)
    w_np = np.asarray(w)                                       # (cout, cin_pg, K)
    wf = np.zeros((cout, K, cin), np.float32)
    for g in range(G):
        r0, r1 = g * cout_pg, (g + 1) * cout_pg
        c0, c1 = g * cin_pg, (g + 1) * cin_pg
        wf[r0:r1, :, c0:c1] = np.transpose(w_np[r0:r1], (0, 2, 1))
    w_bd = jnp.asarray(wf.reshape(cout, K * cin), dtype=W_DTYPE)
    b = (jax.random.normal(kb, (cout,), jnp.float32) * 0.05).reshape(cout, 1)
    return w_bd, b


def make_tcn_params(key, num_inputs, num_channels, K, G):
    blocks = []
    cin = num_inputs
    for i, cout in enumerate(num_channels):
        d = 2 ** i
        key, k1, k2, k3, k4 = jax.random.split(key, 5)
        w1, b1 = init_conv_blockdiag(k1, cout, cin, K, G)
        w2, b2 = init_conv_blockdiag(k2, cout, cout, K, G)
        blk = dict(w1=w1, b1=b1, w2=w2, b2=b2, K=K, dilation=d, cin=cin, cout=cout)
        if cin != cout:                                        # 1x1 ungrouped downsample
            blk["wd"] = (jax.random.normal(k3, (cout, cin), jnp.float32) * 0.05).astype(W_DTYPE)
            blk["bd"] = jax.random.normal(k4, (cout, 1), jnp.float32) * 0.05
        blocks.append(blk)
        cin = cout
    return blocks


def init_params(key, cfg):
    T, N, G, K = cfg["tscale"], cfg["num_sample"], cfg["groups"], cfg["K"]
    C = cfg["base_channels"][-1]
    Ch = cfg["head_channels"][-1]
    H3d, H2d = cfg["hidden_3d"], cfg["hidden_2d"]
    ks = list(jax.random.split(key, 24))
    nrm = lambda k, shp, s=0.05: jax.random.normal(k, shp, jnp.float32) * s

    p = {}
    p["base"] = make_tcn_params(ks[0], cfg["feat_in"], cfg["base_channels"], K, G)
    p["start_tcn"] = make_tcn_params(ks[1], C, cfg["head_channels"], K, G)
    p["end_tcn"] = make_tcn_params(ks[2], C, cfg["head_channels"], K, G)
    p["p_tcn"] = make_tcn_params(ks[3], C, cfg["head_channels"], K, G)

    # 1x1 start/end heads (ungrouped)
    p["w_start"], p["b_start"] = nrm(ks[4], (1, Ch)).astype(W_DTYPE), nrm(ks[5], (1, 1))
    p["w_end"], p["b_end"] = nrm(ks[6], (1, Ch)).astype(W_DTYPE), nrm(ks[7], (1, 1))

    # Conv3d(Ch -> H3d, kernel=(N,1,1), stride=(N,1,1)) stacked n-major: rows n*H3d + h
    p["w3d"] = nrm(ks[8], (N, H3d, Ch)).reshape(N * H3d, Ch).astype(W_DTYPE)
    p["b3d"] = nrm(ks[9], (H3d, 1))

    p["w2d1"], p["b2d1"] = nrm(ks[10], (H2d, H3d)).astype(W_DTYPE), nrm(ks[11], (H2d, 1))
    p["w2d2"], p["b2d2"] = nrm(ks[12], (9, H2d, H2d)).astype(W_DTYPE), nrm(ks[13], (H2d, 1))
    p["w2d3"], p["b2d3"] = nrm(ks[14], (9, H2d, H2d)).astype(W_DTYPE), nrm(ks[15], (H2d, 1))
    p["w2d4"], p["b2d4"] = nrm(ks[16], (2, H2d)).astype(W_DTYPE), nrm(ks[17], (2, 1))

    # shared_weight MLP (torch Linear orientation: (out_features, in_features))
    F = T * C
    H1 = F // 4
    p["w_sw1"], p["b_sw1"] = nrm(ks[18], (H1, F)).astype(W_DTYPE), nrm(ks[19], (H1, 1))
    p["w_sw2"], p["b_sw2"] = nrm(ks[20], (C // 8, C // 4)), nrm(ks[21], (C // 8, 1))
    p["w_sw3"], p["b_sw3"] = nrm(ks[22], (1, C // 8)), nrm(ks[23], (1, 1))

    # largest constant in the model; bf16 halves its DMA traffic (use f32 for parity)
    p["sample_mask"] = get_interp1d_mask(T, cfg["prop_boundary_ratio"], N,
                                         cfg["num_sample_perbin"]).astype(W_DTYPE)
    return p


# ----------------------------------------------------------------------------
# Forward pass (BMN_Student)
# ----------------------------------------------------------------------------
def bmn_student_forward(params, cfg, x, teacher_features=None):
    B, feat_in, T = x.shape
    C = cfg["base_channels"][-1]

    # NCW -> (C, B*T): fold the batch onto the lane axis for every TCN chain
    x_bt = jnp.transpose(x, (1, 0, 2)).reshape(feat_in, B * T)

    base_bt = tcn_chain_forward(x_bt, params["base"], T)                # (C, B*T)
    base_feature = base_bt.reshape(C, B, T).transpose(1, 0, 2)          # (B, C, T)

    weight = None
    if teacher_features is not None:
        n_t = len(teacher_features)
        student_flat = base_feature.reshape(B, -1)                      # (B, F)
        teacher_flat = jnp.concatenate(
            [tf.reshape(B, -1) for tf in teacher_features], axis=0)     # (n_t*B, F)
        student_rep = jnp.tile(student_flat, (n_t, 1))                  # (n_t*B, F)
        scores = shared_weight_forward(teacher_flat.T, student_rep.T,
                                       params, cfg)                     # (1, n_t*B)
        # TODO(synk): softmax over the (tiny) teacher axis stays in JAX glue.
        weight = jax.nn.softmax(scores.reshape(n_t, B).T, axis=1)       # (B, n_t)

    start = tcn_chain_forward(base_bt, params["start_tcn"], T,
                              head=(params["w_start"], params["b_start"])).reshape(B, T)
    end = tcn_chain_forward(base_bt, params["end_tcn"], T,
                            head=(params["w_end"], params["b_end"])).reshape(B, T)

    conf_bt = tcn_chain_forward(base_bt, params["p_tcn"], T)            # (C, B*T)
    conf = conf_bt.reshape(C, B, T).transpose(1, 0, 2)                  # (B, C, T)

    h = bm_conv3d_1x1_forward(conf, params, cfg, T)                     # (B, H2d, T*T)
    h = conv2d_chain_forward(h, params, T)                              # (B, 2, T*T)
    confidence_map = h.reshape(B, 2, T, T)

    if teacher_features is None:
        return confidence_map, start, end
    return weight, confidence_map, start, end, base_feature


# ----------------------------------------------------------------------------
if __name__ == "__main__":
    cfg = dict(
        tscale=16, num_sample=4, num_sample_perbin=2, prop_boundary_ratio=0.5,
        feat_in=32,                     # (original: 500)
        base_channels=[64, 64, 64],     # (original: [512]*6 + [256])
        head_channels=[64, 64, 64],     # (original: [256]*7)
        hidden_3d=32, hidden_2d=16,     # (original: 512 / 128)
        K=2, groups=4,
        s_tile=128,                     # lane tile over the T*T spatial dim (512-1024 at real dims)
        h1_tile=128,                    # tile over shared_weight's first hidden dim (multiple of T)
    )
    B = 2
    key = jax.random.PRNGKey(0)
    kp, kx, kt1, kt2 = jax.random.split(key, 4)
    params = init_params(kp, cfg)

    x = jax.random.normal(kx, (B, cfg["feat_in"], cfg["tscale"]), jnp.float32)
    base_dim = cfg["base_channels"][-1]
    teachers = [
        jax.random.normal(kt1, (B, base_dim, cfg["tscale"]), jnp.float32),
        jax.random.normal(kt2, (B, base_dim, cfg["tscale"]), jnp.float32),
    ]

    outs = bmn_student_forward(params, cfg, x, teachers)
    outs = jax.tree_util.tree_map(lambda a: a.block_until_ready(), outs)

    weight, confidence_map, start, end, base_feature = outs
    assert weight.shape == (B, 2)
    assert confidence_map.shape == (B, 2, cfg["tscale"], cfg["tscale"])
    assert start.shape == (B, cfg["tscale"]) and end.shape == (B, cfg["tscale"])
    assert base_feature.shape == (B, base_dim, cfg["tscale"])
    print("KERNEL_OK")
</pallas_src>

<mosaic_0001>
module attributes {stable_mosaic.version = 11 : i64} {
  func.func @kernel(%arg0: i32, %arg1: memref<32x32xf32, #tpu.memory_space<vmem>>, %arg2: memref<64x64xbf16, #tpu.memory_space<vmem>>, %arg3: memref<64x1xf32, #tpu.memory_space<vmem>>, %arg4: memref<64x128xbf16, #tpu.memory_space<vmem>>, %arg5: memref<64x1xf32, #tpu.memory_space<vmem>>, %arg6: memref<64x32xbf16, #tpu.memory_space<vmem>>, %arg7: memref<64x1xf32, #tpu.memory_space<vmem>>, %arg8: memref<64x128xbf16, #tpu.memory_space<vmem>>, %arg9: memref<64x1xf32, #tpu.memory_space<vmem>>, %arg10: memref<64x128xbf16, #tpu.memory_space<vmem>>, %arg11: memref<64x1xf32, #tpu.memory_space<vmem>>, %arg12: memref<64x128xbf16, #tpu.memory_space<vmem>>, %arg13: memref<64x1xf32, #tpu.memory_space<vmem>>, %arg14: memref<64x128xbf16, #tpu.memory_space<vmem>>, %arg15: memref<64x1xf32, #tpu.memory_space<vmem>>, %arg16: memref<64x32xf32, #tpu.memory_space<vmem>>) attributes {dimension_semantics = [#tpu.dimension_semantics<arbitrary>], iteration_bounds = array<i64: 1>, scalar_prefetch = 0 : i64, scratch_operands = 0 : i64, tpu.core_type = #tpu.core_type<tc>, window_params = [{pipeline_mode = #tpu.pipeline_mode<synchronous>, transform_indices = @transform_0, window_bounds = array<i64: 32, 32>}, {pipeline_mode = #tpu.pipeline_mode<synchronous>, transform_indices = @transform_1, window_bounds = array<i64: 64, 64>}, {pipeline_mode = #tpu.pipeline_mode<synchronous>, transform_indices = @transform_2, window_bounds = array<i64: 64, 1>}, {pipeline_mode = #tpu.pipeline_mode<synchronous>, transform_indices = @transform_3, window_bounds = array<i64: 64, 128>}, {pipeline_mode = #tpu.pipeline_mode<synchronous>, transform_indices = @transform_4, window_bounds = array<i64: 64, 1>}, {pipeline_mode = #tpu.pipeline_mode<synchronous>, transform_indices = @transform_5, window_bounds = array<i64: 64, 32>}, {pipeline_mode = #tpu.pipeline_mode<synchronous>, transform_indices = @transform_6, window_bounds = array<i64: 64, 1>}, {pipeline_mode = #tpu.pipeline_mode<synchronous>, transform_indices = @transform_7, window_bounds = array<i64: 64, 128>}, {pipeline_mode = #tpu.pipeline_mode<synchronous>, transform_indices = @transform_8, window_bounds = array<i64: 64, 1>}, {pipeline_mode = #tpu.pipeline_mode<synchronous>, transform_indices = @transform_9, window_bounds = array<i64: 64, 128>}, {pipeline_mode = #tpu.pipeline_mode<synchronous>, transform_indices = @transform_10, window_bounds = array<i64: 64, 1>}, {pipeline_mode = #tpu.pipeline_mode<synchronous>, transform_indices = @transform_11, window_bounds = array<i64: 64, 128>}, {pipeline_mode = #tpu.pipeline_mode<synchronous>, transform_indices = @transform_12, window_bounds = array<i64: 64, 1>}, {pipeline_mode = #tpu.pipeline_mode<synchronous>, transform_indices = @transform_13, window_bounds = array<i64: 64, 128>}, {pipeline_mode = #tpu.pipeline_mode<synchronous>, transform_indices = @transform_14, window_bounds = array<i64: 64, 1>}, {pipeline_mode = #tpu.pipeline_mode<synchronous>, transform_indices = @transform_15, window_bounds = array<i64: 64, 32>}]} {
    %0 = tpu.iota {dimensions = array<i32: 1>} : vector<1x32xi32>
    %c16_i32 = arith.constant 16 : i32
    %c0_i32 = arith.constant 0 : i32
    %1 = arith.cmpi eq, %c16_i32, %c0_i32 : i32
    %c1_i32 = arith.constant 1 : i32
    %2 = arith.select %1, %c1_i32, %c16_i32 : i32
    %3 = vector.broadcast %2 : i32 to vector<1x32xi32>
    %4 = arith.remsi %0, %3 : vector<1x32xi32>
    %c0_i32_0 = arith.constant 0 : i32
    %5 = vector.broadcast %c0_i32_0 : i32 to vector<1x32xi32>
    %6 = arith.cmpi ne, %4, %5 : vector<1x32xi32>
    %c0_i32_1 = arith.constant 0 : i32
    %7 = vector.broadcast %c0_i32_1 : i32 to vector<1x32xi32>
    %8 = arith.cmpi slt, %4, %7 : vector<1x32xi32>
    %c0_i32_2 = arith.constant 0 : i32
    %9 = arith.cmpi slt, %2, %c0_i32_2 : i32
    %10 = vector.broadcast %9 : i1 to vector<1x32xi1>
    %11 = vector.broadcast %10 : vector<1x32xi1> to vector<1x32xi1>
    %12 = arith.xori %8, %11 : vector<1x32xi1>
    %13 = arith.andi %12, %6 : vector<1x32xi1>
    %14 = vector.broadcast %2 : i32 to vector<1x32xi32>
    %15 = arith.addi %4, %14 : vector<1x32xi32>
    %16 = arith.select %13, %15, %4 : vector<1x32xi1>, vector<1x32xi32>
    %c0 = arith.constant 0 : index
    %c0_3 = arith.constant 0 : index
    %17 = vector.load %arg1[%c0, %c0_3] : memref<32x32xf32, #tpu.memory_space<vmem>>, vector<32x32xf32>
    %c1_i32_4 = arith.constant 1 : i32
    %18 = tpu.dynamic_rotate %17 by %c1_i32_4 dim 1 : vector<32x32xf32>, i32 -> vector<32x32xf32>
    %c1_i32_5 = arith.constant 1 : i32
    %19 = vector.broadcast %c1_i32_5 : i32 to vector<1x32xi32>
    %20 = arith.cmpi sge, %16, %19 : vector<1x32xi32>
    %cst = arith.constant 0.000000e+00 : f32
    %21 = vector.shape_cast %20 : vector<1x32xi1> to vector<1x32xi1>
    %22 = vector.broadcast %21 : vector<1x32xi1> to vector<32x32xi1>
    %23 = vector.broadcast %cst : f32 to vector<32x32xf32>
    %24 = arith.select %22, %18, %23 : vector<32x32xi1>, vector<32x32xf32>
    %25 = tpu.concatenate %24, %17 in 0 : vector<32x32xf32>, vector<32x32xf32> -> vector<64x32xf32>
    %c0_6 = arith.constant 0 : index
    %c0_7 = arith.constant 0 : index
    %26 = vector.load %arg2[%c0_6, %c0_7] : memref<64x64xbf16, #tpu.memory_space<vmem>>, vector<64x64xbf16>
    %27 = arith.truncf %25 : vector<64x32xf32> to vector<64x32xbf16>
    %cst_8 = arith.constant dense<0.000000e+00> : vector<64x32xf32>
    %28 = tpu.matmul %26, %27, %cst_8 {dimension_numbers = #tpu.dot_dimension_numbers<[1], [0], [0], [1], [0, 0, 1, 1], [], []>} : vector<64x64xbf16>, vector<64x32xbf16>, vector<64x32xf32> -> vector<64x32xf32>
    %c0_9 = arith.constant 0 : index
    %c0_10 = arith.constant 0 : index
    %29 = vector.load %arg3[%c0_9, %c0_10] : memref<64x1xf32, #tpu.memory_space<vmem>>, vector<64x1xf32>
    %30 = vector.broadcast %29 : vector<64x1xf32> to vector<64x32xf32>
    %31 = arith.addf %28, %30 : vector<64x32xf32>
    %cst_11 = arith.constant 0.000000e+00 : f32
    %32 = vector.broadcast %cst_11 : f32 to vector<64x32xf32>
    %33 = arith.maximumf %31, %32 : vector<64x32xf32>
    %c1_i32_12 = arith.constant 1 : i32
    %34 = tpu.dynamic_rotate %33 by %c1_i32_12 dim 1 : vector<64x32xf32>, i32 -> vector<64x32xf32>
    %c1_i32_13 = arith.constant 1 : i32
    %35 = vector.broadcast %c1_i32_13 : i32 to vector<1x32xi32>
    %36 = arith.cmpi sge, %16, %35 : vector<1x32xi32>
    %cst_14 = arith.constant 0.000000e+00 : f32
    %37 = vector.shape_cast %36 : vector<1x32xi1> to vector<1x32xi1>
    %38 = vector.broadcast %37 : vector<1x32xi1> to vector<64x32xi1>
    %39 = vector.broadcast %cst_14 : f32 to vector<64x32xf32>
    %40 = arith.select %38, %34, %39 : vector<64x32xi1>, vector<64x32xf32>
    %41 = tpu.concatenate %40, %33 in 0 : vector<64x32xf32>, vector<64x32xf32> -> vector<128x32xf32>
    %c0_15 = arith.constant 0 : index
    %c0_16 = arith.constant 0 : index
    %42 = vector.load %arg4[%c0_15, %c0_16] : memref<64x128xbf16, #tpu.memory_space<vmem>>, vector<64x128xbf16>
    %43 = arith.truncf %41 : vector<128x32xf32> to vector<128x32xbf16>
    %cst_17 = arith.constant dense<0.000000e+00> : vector<64x32xf32>
    %44 = tpu.matmul %42, %43, %cst_17 {dimension_numbers = #tpu.dot_dimension_numbers<[1], [0], [0], [1], [0, 0, 1, 1], [], []>} : vector<64x128xbf16>, vector<128x32xbf16>, vector<64x32xf32> -> vector<64x32xf32>
    %c0_18 = arith.constant 0 : index
    %c0_19 = arith.constant 0 : index
    %45 = vector.load %arg5[%c0_18, %c0_19] : memref<64x1xf32, #tpu.memory_space<vmem>>, vector<64x1xf32>
    %46 = vector.broadcast %45 : vector<64x1xf32> to vector<64x32xf32>
    %47 = arith.addf %44, %46 : vector<64x32xf32>
    %cst_20 = arith.constant 0.000000e+00 : f32
    %48 = vector.broadcast %cst_20 : f32 to vector<64x32xf32>
    %49 = arith.maximumf %47, %48 : vector<64x32xf32>
    %c0_21 = arith.constant 0 : index
    %c0_22 = arith.constant 0 : index
    %50 = vector.load %arg6[%c0_21, %c0_22] : memref<64x32xbf16, #tpu.memory_space<vmem>>, vector<64x32xbf16>
    %51 = arith.truncf %17 : vector<32x32xf32> to vector<32x32xbf16>
    %cst_23 = arith.constant dense<0.000000e+00> : vector<64x32xf32>
    %52 = tpu.matmul %50, %51, %cst_23 {dimension_numbers = #tpu.dot_dimension_numbers<[1], [0], [0], [1], [0, 0, 1, 1], [], []>} : vector<64x32xbf16>, vector<32x32xbf16>, vector<64x32xf32> -> vector<64x32xf32>
    %c0_24 = arith.constant 0 : index
    %c0_25 = arith.constant 0 : index
    %53 = vector.load %arg7[%c0_24, %c0_25] : memref<64x1xf32, #tpu.memory_space<vmem>>, vector<64x1xf32>
    %54 = vector.broadcast %53 : vector<64x1xf32> to vector<64x32xf32>
    %55 = arith.addf %52, %54 : vector<64x32xf32>
    %56 = arith.addf %49, %55 : vector<64x32xf32>
    %cst_26 = arith.constant 0.000000e+00 : f32
    %57 = vector.broadcast %cst_26 : f32 to vector<64x32xf32>
    %58 = arith.maximumf %56, %57 : vector<64x32xf32>
    %c2_i32 = arith.constant 2 : i32
    %59 = tpu.dynamic_rotate %58 by %c2_i32 dim 1 : vector<64x32xf32>, i32 -> vector<64x32xf32>
    %c2_i32_27 = arith.constant 2 : i32
    %60 = vector.broadcast %c2_i32_27 : i32 to vector<1x32xi32>
    %61 = arith.cmpi sge, %16, %60 : vector<1x32xi32>
    %cst_28 = arith.constant 0.000000e+00 : f32
    %62 = vector.shape_cast %61 : vector<1x32xi1> to vector<1x32xi1>
    %63 = vector.broadcast %62 : vector<1x32xi1> to vector<64x32xi1>
    %64 = vector.broadcast %cst_28 : f32 to vector<64x32xf32>
    %65 = arith.select %63, %59, %64 : vector<64x32xi1>, vector<64x32xf32>
    %66 = tpu.concatenate %65, %58 in 0 : vector<64x32xf32>, vector<64x32xf32> -> vector<128x32xf32>
    %c0_29 = arith.constant 0 : index
    %c0_30 = arith.constant 0 : index
    %67 = vector.load %arg8[%c0_29, %c0_30] : memref<64x128xbf16, #tpu.memory_space<vmem>>, vector<64x128xbf16>
    %68 = arith.truncf %66 : vector<128x32xf32> to vector<128x32xbf16>
    %cst_31 = arith.constant dense<0.000000e+00> : vector<64x32xf32>
    %69 = tpu.matmul %67, %68, %cst_31 {dimension_numbers = #tpu.dot_dimension_numbers<[1], [0], [0], [1], [0, 0, 1, 1], [], []>} : vector<64x128xbf16>, vector<128x32xbf16>, vector<64x32xf32> -> vector<64x32xf32>
    %c0_32 = arith.constant 0 : index
    %c0_33 = arith.constant 0 : index
    %70 = vector.load %arg9[%c0_32, %c0_33] : memref<64x1xf32, #tpu.memory_space<vmem>>, vector<64x1xf32>
    %71 = vector.broadcast %70 : vector<64x1xf32> to vector<64x32xf32>
    %72 = arith.addf %69, %71 : vector<64x32xf32>
    %cst_34 = arith.constant 0.000000e+00 : f32
    %73 = vector.broadcast %cst_34 : f32 to vector<64x32xf32>
    %74 = arith.maximumf %72, %73 : vector<64x32xf32>
    %c2_i32_35 = arith.constant 2 : i32
    %75 = tpu.dynamic_rotate %74 by %c2_i32_35 dim 1 : vector<64x32xf32>, i32 -> vector<64x32xf32>
    %c2_i32_36 = arith.constant 2 : i32
    %76 = vector.broadcast %c2_i32_36 : i32 to vector<1x32xi32>
    %77 = arith.cmpi sge, %16, %76 : vector<1x32xi32>
    %cst_37 = arith.constant 0.000000e+00 : f32
    %78 = vector.shape_cast %77 : vector<1x32xi1> to vector<1x32xi1>
    %79 = vector.broadcast %78 : vector<1x32xi1> to vector<64x32xi1>
    %80 = vector.broadcast %cst_37 : f32 to vector<64x32xf32>
    %81 = arith.select %79, %75, %80 : vector<64x32xi1>, vector<64x32xf32>
    %82 = tpu.concatenate %81, %74 in 0 : vector<64x32xf32>, vector<64x32xf32> -> vector<128x32xf32>
    %c0_38 = arith.constant 0 : index
    %c0_39 = arith.constant 0 : index
    %83 = vector.load %arg10[%c0_38, %c0_39] : memref<64x128xbf16, #tpu.memory_space<vmem>>, vector<64x128xbf16>
    %84 = arith.truncf %82 : vector<128x32xf32> to vector<128x32xbf16>
    %cst_40 = arith.constant dense<0.000000e+00> : vector<64x32xf32>
    %85 = tpu.matmul %83, %84, %cst_40 {dimension_numbers = #tpu.dot_dimension_numbers<[1], [0], [0], [1], [0, 0, 1, 1], [], []>} : vector<64x128xbf16>, vector<128x32xbf16>, vector<64x32xf32> -> vector<64x32xf32>
    %c0_41 = arith.constant 0 : index
    %c0_42 = arith.constant 0 : index
    %86 = vector.load %arg11[%c0_41, %c0_42] : memref<64x1xf32, #tpu.memory_space<vmem>>, vector<64x1xf32>
    %87 = vector.broadcast %86 : vector<64x1xf32> to vector<64x32xf32>
    %88 = arith.addf %85, %87 : vector<64x32xf32>
    %cst_43 = arith.constant 0.000000e+00 : f32
    %89 = vector.broadcast %cst_43 : f32 to vector<64x32xf32>
    %90 = arith.maximumf %88, %89 : vector<64x32xf32>
    %91 = arith.addf %90, %58 : vector<64x32xf32>
    %cst_44 = arith.constant 0.000000e+00 : f32
    %92 = vector.broadcast %cst_44 : f32 to vector<64x32xf32>
    %93 = arith.maximumf %91, %92 : vector<64x32xf32>
    %c4_i32 = arith.constant 4 : i32
    %94 = tpu.dynamic_rotate %93 by %c4_i32 dim 1 : vector<64x32xf32>, i32 -> vector<64x32xf32>
    %c4_i32_45 = arith.constant 4 : i32
    %95 = vector.broadcast %c4_i32_45 : i32 to vector<1x32xi32>
    %96 = arith.cmpi sge, %16, %95 : vector<1x32xi32>
    %cst_46 = arith.constant 0.000000e+00 : f32
    %97 = vector.shape_cast %96 : vector<1x32xi1> to vector<1x32xi1>
    %98 = vector.broadcast %97 : vector<1x32xi1> to vector<64x32xi1>
    %99 = vector.broadcast %cst_46 : f32 to vector<64x32xf32>
    %100 = arith.select %98, %94, %99 : vector<64x32xi1>, vector<64x32xf32>
    %101 = tpu.concatenate %100, %93 in 0 : vector<64x32xf32>, vector<64x32xf32> -> vector<128x32xf32>
    %c0_47 = arith.constant 0 : index
    %c0_48 = arith.constant 0 : index
    %102 = vector.load %arg12[%c0_47, %c0_48] : memref<64x128xbf16, #tpu.memory_space<vmem>>, vector<64x128xbf16>
    %103 = arith.truncf %101 : vector<128x32xf32> to vector<128x32xbf16>
    %cst_49 = arith.constant dense<0.000000e+00> : vector<64x32xf32>
    %104 = tpu.matmul %102, %103, %cst_49 {dimension_numbers = #tpu.dot_dimension_numbers<[1], [0], [0], [1], [0, 0, 1, 1], [], []>} : vector<64x128xbf16>, vector<128x32xbf16>, vector<64x32xf32> -> vector<64x32xf32>
    %c0_50 = arith.constant 0 : index
    %c0_51 = arith.constant 0 : index
    %105 = vector.load %arg13[%c0_50, %c0_51] : memref<64x1xf32, #tpu.memory_space<vmem>>, vector<64x1xf32>
    %106 = vector.broadcast %105 : vector<64x1xf32> to vector<64x32xf32>
    %107 = arith.addf %104, %106 : vector<64x32xf32>
    %cst_52 = arith.constant 0.000000e+00 : f32
    %108 = vector.broadcast %cst_52 : f32 to vector<64x32xf32>
    %109 = arith.maximumf %107, %108 : vector<64x32xf32>
    %c4_i32_53 = arith.constant 4 : i32
    %110 = tpu.dynamic_rotate %109 by %c4_i32_53 dim 1 : vector<64x32xf32>, i32 -> vector<64x32xf32>
    %c4_i32_54 = arith.constant 4 : i32
    %111 = vector.broadcast %c4_i32_54 : i32 to vector<1x32xi32>
    %112 = arith.cmpi sge, %16, %111 : vector<1x32xi32>
    %cst_55 = arith.constant 0.000000e+00 : f32
    %113 = vector.shape_cast %112 : vector<1x32xi1> to vector<1x32xi1>
    %114 = vector.broadcast %113 : vector<1x32xi1> to vector<64x32xi1>
    %115 = vector.broadcast %cst_55 : f32 to vector<64x32xf32>
    %116 = arith.select %114, %110, %115 : vector<64x32xi1>, vector<64x32xf32>
    %117 = tpu.concatenate %116, %109 in 0 : vector<64x32xf32>, vector<64x32xf32> -> vector<128x32xf32>
    %c0_56 = arith.constant 0 : index
    %c0_57 = arith.constant 0 : index
    %118 = vector.load %arg14[%c0_56, %c0_57] : memref<64x128xbf16, #tpu.memory_space<vmem>>, vector<64x128xbf16>
    %119 = arith.truncf %117 : vector<128x32xf32> to vector<128x32xbf16>
    %cst_58 = arith.constant dense<0.000000e+00> : vector<64x32xf32>
    %120 = tpu.matmul %118, %119, %cst_58 {dimension_numbers = #tpu.dot_dimension_numbers<[1], [0], [0], [1], [0, 0, 1, 1], [], []>} : vector<64x128xbf16>, vector<128x32xbf16>, vector<64x32xf32> -> vector<64x32xf32>
    %c0_59 = arith.constant 0 : index
    %c0_60 = arith.constant 0 : index
    %121 = vector.load %arg15[%c0_59, %c0_60] : memref<64x1xf32, #tpu.memory_space<vmem>>, vector<64x1xf32>
    %122 = vector.broadcast %121 : vector<64x1xf32> to vector<64x32xf32>
    %123 = arith.addf %120, %122 : vector<64x32xf32>
    %cst_61 = arith.constant 0.000000e+00 : f32
    %124 = vector.broadcast %cst_61 : f32 to vector<64x32xf32>
    %125 = arith.maximumf %123, %124 : vector<64x32xf32>
    %126 = arith.addf %125, %93 : vector<64x32xf32>
    %cst_62 = arith.constant 0.000000e+00 : f32
    %127 = vector.broadcast %cst_62 : f32 to vector<64x32xf32>
    %128 = arith.maximumf %126, %127 : vector<64x32xf32>
    %c0_63 = arith.constant 0 : index
    %c0_64 = arith.constant 0 : index
    %129 = vector.load %arg16[%c0_63, %c0_64] : memref<64x32xf32, #tpu.memory_space<vmem>>, vector<64x32xf32>
    tpu.vector_store %arg16[%c0_63, %c0_64], %128 {strides = array<i32>} : memref<64x32xf32, #tpu.memory_space<vmem>>, vector<64x32xf32>,
    return
  }
  func.func @transform_0(%arg0: i32) -> (i32, i32) {
    %c0_i32 = arith.constant 0 : i32
    %c0_i32_0 = arith.constant 0 : i32
    %c0_i32_1 = arith.constant 0 : i32
    return %c0_i32, %c0_i32_0 : i32, i32
  }
  func.func @transform_1(%arg0: i32) -> (i32, i32) {
    %c0_i32 = arith.constant 0 : i32
    %c0_i32_0 = arith.constant 0 : i32
    %c0_i32_1 = arith.constant 0 : i32
    return %c0_i32, %c0_i32_0 : i32, i32
  }
  func.func @transform_2(%arg0: i32) -> (i32, i32) {
    %c0_i32 = arith.constant 0 : i32
    %c0_i32_0 = arith.constant 0 : i32
    %c0_i32_1 = arith.constant 0 : i32
    return %c0_i32, %c0_i32_0 : i32, i32
  }
  func.func @transform_3(%arg0: i32) -> (i32, i32) {
    %c0_i32 = arith.constant 0 : i32
    %c0_i32_0 = arith.constant 0 : i32
    %c0_i32_1 = arith.constant 0 : i32
    return %c0_i32, %c0_i32_0 : i32, i32
  }
  func.func @transform_4(%arg0: i32) -> (i32, i32) {
    %c0_i32 = arith.constant 0 : i32
    %c0_i32_0 = arith.constant 0 : i32
    %c0_i32_1 = arith.constant 0 : i32
    return %c0_i32, %c0_i32_0 : i32, i32
  }
  func.func @transform_5(%arg0: i32) -> (i32, i32) {
    %c0_i32 = arith.constant 0 : i32
    %c0_i32_0 = arith.constant 0 : i32
    %c0_i32_1 = arith.constant 0 : i32
    return %c0_i32, %c0_i32_0 : i32, i32
  }
  func.func @transform_6(%arg0: i32) -> (i32, i32) {
    %c0_i32 = arith.constant 0 : i32
    %c0_i32_0 = arith.constant 0 : i32
    %c0_i32_1 = arith.constant 0 : i32
    return %c0_i32, %c0_i32_0 : i32, i32
  }
  func.func @transform_7(%arg0: i32) -> (i32, i32) {
    %c0_i32 = arith.constant 0 : i32
    %c0_i32_0 = arith.constant 0 : i32
    %c0_i32_1 = arith.constant 0 : i32
    return %c0_i32, %c0_i32_0 : i32, i32
  }
  func.func @transform_8(%arg0: i32) -> (i32, i32) {
    %c0_i32 = arith.constant 0 : i32
    %c0_i32_0 = arith.constant 0 : i32
    %c0_i32_1 = arith.constant 0 : i32
    return %c0_i32, %c0_i32_0 : i32, i32
  }
  func.func @transform_9(%arg0: i32) -> (i32, i32) {
    %c0_i32 = arith.constant 0 : i32
    %c0_i32_0 = arith.constant 0 : i32
    %c0_i32_1 = arith.constant 0 : i32
    return %c0_i32, %c0_i32_0 : i32, i32
  }
  func.func @transform_10(%arg0: i32) -> (i32, i32) {
    %c0_i32 = arith.constant 0 : i32
    %c0_i32_0 = arith.constant 0 : i32
    %c0_i32_1 = arith.constant 0 : i32
    return %c0_i32, %c0_i32_0 : i32, i32
  }
  func.func @transform_11(%arg0: i32) -> (i32, i32) {
    %c0_i32 = arith.constant 0 : i32
    %c0_i32_0 = arith.constant 0 : i32
    %c0_i32_1 = arith.constant 0 : i32
    return %c0_i32, %c0_i32_0 : i32, i32
  }
  func.func @transform_12(%arg0: i32) -> (i32, i32) {
    %c0_i32 = arith.constant 0 : i32
    %c0_i32_0 = arith.constant 0 : i32
    %c0_i32_1 = arith.constant 0 : i32
    return %c0_i32, %c0_i32_0 : i32, i32
  }
  func.func @transform_13(%arg0: i32) -> (i32, i32) {
    %c0_i32 = arith.constant 0 : i32
    %c0_i32_0 = arith.constant 0 : i32
    %c0_i32_1 = arith.constant 0 : i32
    return %c0_i32, %c0_i32_0 : i32, i32
  }
  func.func @transform_14(%arg0: i32) -> (i32, i32) {
    %c0_i32 = arith.constant 0 : i32
    %c0_i32_0 = arith.constant 0 : i32
    %c0_i32_1 = arith.constant 0 : i32
    return %c0_i32, %c0_i32_0 : i32, i32
  }
  func.func @transform_15(%arg0: i32) -> (i32, i32) {
    %c0_i32 = arith.constant 0 : i32
    %c0_i32_0 = arith.constant 0 : i32
    %c0_i32_1 = arith.constant 0 : i32
    return %c0_i32, %c0_i32_0 : i32, i32
  }
}

</mosaic_0001>

<bundles_post_ra>
// kernel: tpu_custom_call.1
= control target key start
LH: loop header
LB: loop body
LE: loop exit
PB: predicated region body
PF: predicated region fallthrough
CT: control target
= control target key end

     0   :  { %s2437_s26 = smov 32   ;;  %vm69_vm0 = vcmask 1047808   ;;  %vm197_vm1 = vcmask 523264   ;;  %s2438_s28 = smov 97   ;;  %v2439_v33 = vmov 0   ;;  %v51_v42 = vlaneseq  ;;  %s3347_s0 = inlined_call_operand.vmem [shape: f32[32,32], index: 0, kind: input, shape index: {}]   ;;  %s3348_s1 = inlined_call_operand.vmem [shape: bf16[64,64], index: 1, kind: input, shape index: {}]   ;;  %s3349_s2 = inlined_call_operand.vmem [shape: f32[64,1], index: 2, kind: input, shape index: {}]   ;;  %s3350_s5 = inlined_call_operand.vmem [shape: bf16[64,32], index: 5, kind: input, shape index: {}]   ;;  %s3351_s4 = inlined_call_operand.vmem [shape: f32[64,1], index: 4, kind: input, shape index: {}]   ;;  %s3352_s3 = inlined_call_operand.vmem [shape: bf16[64,128], index: 3, kind: input, shape index: {}]   ;;  %s3353_s6 = inlined_call_operand.vmem [shape: f32[64,1], index: 6, kind: input, shape index: {}]   ;;  %s3354_s8 = inlined_call_operand.vmem [shape: f32[64,1], index: 8, kind: input, shape index: {}]   ;;  %s3355_s7 = inlined_call_operand.vmem [shape: bf16[64,128], index: 7, kind: input, shape index: {}]   ;;  %s3356_s10 = inlined_call_operand.vmem [shape: f32[64,1], index: 10, kind: input, shape index: {}]   ;;  %s3357_s9 = inlined_call_operand.vmem [shape: bf16[64,128], index: 9, kind: input, shape index: {}]   ;;  %s3358_s12 = inlined_call_operand.vmem [shape: f32[64,1], index: 12, kind: input, shape index: {}]   ;;  %s3359_s11 = inlined_call_operand.vmem [shape: bf16[64,128], index: 11, kind: input, shape index: {}]   ;;  %s3360_s14 = inlined_call_operand.vmem [shape: f32[64,1], index: 14, kind: input, shape index: {}]   ;;  %s3361_s13 = inlined_call_operand.vmem [shape: bf16[64,128], index: 13, kind: input, shape index: {}]   ;;  %s3362_s15 = inlined_call_operand.vmem [shape: f32[64,32], index: 15, kind: output, shape index: {}]  }
   0x1   :  { %v67_v0 = vld [vmem:[%s3347_s0 + $0x10] sm:$0xff]  ;;  %v68_v1 = vld [vmem:[%s3347_s0 + $0x18] sm:$0xff]  ;;  %v65_v2 = vld [vmem:[%s3347_s0] sm:$0xff]  ;;  %2108 = vset.pattern.permute.xlu1 %v2439_v33  ;;  %2107 = vset.pattern.permute.xlu0 %v2439_v33  ;;  %vm608_vm4 = vcmask 261120  }
   0x2   :  { %v2077_v3 = vpack.i.bf16 %v68_v1, %v67_v0  ;;  %v66_v4 = vld [vmem:[%s3347_s0 + $0x8] sm:$0xff]  ;;  %v2536_v9 = vpack.c.bf16 %v68_v1, %v67_v0  ;;  %v2409_v23 = vld [vmem:[%s3348_s1] sm:$0xff]   ;;  %v136_v34 = vld [vmem:[%s3349_s2 + $0x38] sm:$0xff]  ;;  %v52_v43 = vand.u32 127, %v51_v42 }
   0x3   :  { %v2082_v5 = vpack.i.bf16 %v66_v4, %v65_v2  ;;  %v2546_v19 = vpack.c.bf16 %v66_v4, %v65_v2  ;;  %1932 = vmatprep.mubr.msk.bf16.mxu0 %vm197_vm1, %v2409_v23  ;;  %v135_v35 = vld [vmem:[%s3349_s2 + $0x30] sm:$0xff]  ;;  %v133_v36 = vld [vmem:[%s3349_s2 + $0x20] sm:$0xff]  ;;  %v134_v37 = vld [vmem:[%s3349_s2 + $0x28] sm:$0xff] }
   0x4   :  { %2078 = vrot.lane.b32.xlu0 %v2077_v3, %s2437_s26  ;;  %1924 = vmatprep.subr.bf16.mxu0 %v2536_v9  ;;  %v131_v38 = vld [vmem:[%s3349_s2 + $0x10] sm:$0xff]  ;;  %v132_v39 = vld [vmem:[%s3349_s2 + $0x18] sm:$0xff]  ;;  %v129_v40 = vld [vmem:[%s3349_s2] sm:$0xff]  ;;  %v2584_v44 = vand.u32 15, %v52_v43 }
   0x5   :  { %1925 = vmatpush3.bf16.msra.mxu0 %v2536_v9  ;;  %v130_v41 = vld [vmem:[%s3349_s2 + $0x8] sm:$0xff]  ;;  %v2411_v55 = vld [vmem:[%s3348_s1 + $0x10] sm:$0xff]   ;;  %v2412_v56 = vld [vmem:[%s3348_s1 + $0x18] sm:$0xff]  }
   0x6   :  { %1926 = vmatprep.subr.bf16.mxu0 %v2546_v19  ;;  %vm94_vm2 = vcmp.ge.s32.totalorder %v2584_v44, 1  ;;  %v2410_v54 = vld [vmem:[%s3348_s1 + $0x8] sm:$0xff]   ;;  %vm750_vm5 = vcmp.ge.s32.totalorder %v2584_v44, 2  ;;  %vm1267_vm7 = vcmp.ge.s32.totalorder %v2584_v44, 4 }
   0x7   :  { %vm2587_vm3 = vmpackc.low %vm94_vm2, %vm94_vm2 }
   0x8   :  { %2083 = vrot.lane.b32.xlu0 %v2082_v5, %s2437_s26  ;;  %vm2887_vm6 = vmpackc.low %vm750_vm5, %vm750_vm5 }
   0x9   :  { %1927 = vmatpush3.bf16.msra.mxu0 %v2546_v19  ;;  %vm3156_vm8 = vmpackc.low %vm1267_vm7, %vm1267_vm7 }
  0x76   :  { %v2079_v6 = vpop.permute.xlu0 %2078 }
  0x77   :  { %v2081_v7 = vunpack.i.h.bf16 %v2079_v6  ;;  %v2080_v8 = vunpack.i.l.bf16 %v2079_v6 }
  0x79   :  { %v78_v10 = vsel %vm69_vm0, %v2080_v8, %v67_v0  ;;  %v81_v11 = vsel %vm69_vm0, %v2081_v7, %v68_v1 }
  0x7a   :  { %v2084_v12 = vpop.permute.xlu0 %2083  ;;  %v2087_v13 = vpack.i.bf16 %v81_v11, %v78_v10 }
  0x7b   :  { %v2086_v14 = vunpack.i.h.bf16 %v2084_v12  ;;  %v2085_v15 = vunpack.i.l.bf16 %v2084_v12 }
  0x7c   :  { %2088 = vrot.lane.b32.xlu1 %v2087_v13, %s2437_s26 }
  0x7d   :  { %v72_v16 = vsel %vm69_vm0, %v2085_v15, %v65_v2  ;;  %v75_v17 = vsel %vm69_vm0, %v2086_v14, %v66_v4 }
  0x7e   :  { %v2092_v18 = vpack.i.bf16 %v75_v17, %v72_v16 }
  0x80   :  { %2093 = vrot.lane.b32.xlu1 %v2092_v18, %s2437_s26 }
  0xee   :  { %v2089_v20 = vpop.permute.xlu1 %2088 }
  0xef   :  { %v2091_v21 = vunpack.i.h.bf16 %v2089_v20  ;;  %v2090_v22 = vunpack.i.l.bf16 %v2089_v20 }
  0xf1   :  { %v92_v24 = vsel %vm69_vm0, %v2090_v22, %v67_v0  ;;  %v93_v25 = vsel %vm69_vm0, %v2091_v21, %v68_v1 }
  0xf2   :  { %v2094_v26 = vpop.permute.xlu1 %2093  ;;  %v2097_v27 = vpack.i.bf16 %v93_v25, %v92_v24  ;;  %v2413_v25 = vld [vmem:[%s3350_s5] sm:$0xff]  }
  0xf3   :  { %v2096_v28 = vunpack.i.h.bf16 %v2094_v26  ;;  %v2095_v29 = vunpack.i.l.bf16 %v2094_v26 }
  0xf4   :  { %2098 = vrot.lane.b32.xlu0 %v2097_v27, %s2438_s28 }
  0xf5   :  { %v90_v30 = vsel %vm69_vm0, %v2095_v29, %v65_v2  ;;  %v91_v31 = vsel %vm69_vm0, %v2096_v28, %v66_v4  ;;  %v2414_v29 = vld [vmem:[%s3350_s5 + $0x8] sm:$0xff]  }
  0xf6   :  { %v2102_v32 = vpack.i.bf16 %v91_v31, %v90_v30  ;;  %v2415_v30 = vld [vmem:[%s3350_s5 + $0x10] sm:$0xff]  }
  0xf8   :  { %2103 = vrot.lane.b32.xlu1 %v2102_v32, %s2438_s28  ;;  %169 = vperm.xlu0 %2107, %v135_v35   ;;  %v2416_v35 = vld [vmem:[%s3350_s5 + $0x18] sm:$0xff]  }
  0xfc   :  { %174 = vperm.xlu1 %2108, %v136_v34   ;;  %164 = vperm.xlu0 %2107, %v134_v37  }
 0x100   :  { %159 = vperm.xlu1 %2108, %v133_v36   ;;  %154 = vperm.xlu0 %2107, %v132_v39  }
 0x104   :  { %149 = vperm.xlu1 %2108, %v131_v38   ;;  %144 = vperm.xlu0 %2107, %v130_v41  }
 0x108   :  { %139 = vperm.xlu1 %2108, %v129_v40  }
 0x166   :  { %v2099_v45 = vpop.permute.xlu0 %2098 }
 0x167   :  { %v2101_v46 = vunpack.i.h.bf16 %v2099_v45  ;;  %v2100_v47 = vunpack.i.l.bf16 %v2099_v45 }
 0x169   :  { %v1753_v49 = vpack.c.bf16 %v2101_v46, %v2100_v47 }
 0x16a   :  { %v2104_v50 = vpop.permute.xlu1 %2103 }
 0x16b   :  { %v2106_v51 = vunpack.i.h.bf16 %v2104_v50  ;;  %v2105_v52 = vunpack.i.l.bf16 %v2104_v50  ;;  %1928 = vmatprep.subr.msk.bf16.mxu0 %vm2587_vm3, %v1753_v49 }
 0x16c   :  { %1929 = vmatpush3.bf16.msk.msra.mxu0 %vm2587_vm3, %v1753_v49 }
 0x16d   :  { %v1756_v53 = vpack.c.bf16 %v2106_v51, %v2105_v52 }
 0x16f   :  { %1930 = vmatprep.subr.msk.bf16.mxu0 %vm2587_vm3, %v1756_v53 }
 0x170   :  { %1931 = vmatpush3.bf16.msk.msra.mxu0 %vm2587_vm3, %v1756_v53 }
 0x171   :  { %1964 = vmatprep.subr.bf16.mxu0 %v2536_v9 }
 0x173   :  { %1933 = vmatmul.mubr.msk.bf16.vlgmr.msra.gmra.mxu0 %vm197_vm1, %v2410_v54  ;;  %v170_v57 = vpop.permute.xlu0 %169 }
 0x174   :  { %1936 = vmatprep.mubr.msk.bf16.mxu0 %vm197_vm1, %v2411_v55  ;;  %1965 = vmatpush3.bf16.msra.mxu0 %v2536_v9 }
 0x175   :  { %1966 = vmatprep.subr.bf16.mxu0 %v2546_v19 }
 0x177   :  { %v175_v58 = vpop.permute.xlu1 %174  ;;  %v165_v59 = vpop.permute.xlu0 %164 }
 0x178   :  { %1967 = vmatpush3.bf16.msra.mxu0 %v2546_v19 }
 0x17b   :  { %1937 = vmatmul.mubr.msk.bf16.gmra.mxu0 %vm197_vm1, %v2412_v56  ;;  %v160_v61 = vpop.permute.xlu1 %159  ;;  %v155_v0 = vpop.permute.xlu0 %154 }
 0x17c   :  { %1968 = vmatprep.mubr.msk.bf16.mxu0 %vm608_vm4, %v2413_v25  ;;  %v2417_v25 = vld [vmem:[%s3352_s3] sm:$0xff]  }
 0x17d   :  { %1956 = vmatprep.mubr.bf16.mxu1 %v2417_v25 }
 0x17f   :  { %v150_v2 = vpop.permute.xlu1 %149  ;;  %v145_v7 = vpop.permute.xlu0 %144 }
 0x183   :  { %v140_v10 = vpop.permute.xlu1 %139  ;;  %1969 = vmatmul.mubr.msk.bf16.vlgmr.msra.gmra.mxu0 %vm608_vm4, %v2414_v29  ;;  %v392_v29 = vld [vmem:[%s3351_s4 + $0x28] sm:$0xff] }
 0x184   :  { %1972 = vmatprep.mubr.msk.bf16.mxu0 %vm608_vm4, %v2415_v30  ;;  %v544_v30 = vld [vmem:[%s3353_s6 + $0x20] sm:$0xff] }
 0x18b   :  { %1973 = vmatmul.mubr.msk.bf16.gmra.mxu0 %vm608_vm4, %v2416_v35  ;;  %v543_v35 = vld [vmem:[%s3353_s6 + $0x18] sm:$0xff] }
 0x233   :  { %v1934_v60 = vpop.f32.mrf.mxu0 }
 0x234   :  { %v253_v12 = vadd.f32 %v1934_v60, %v150_v2 }
 0x235   :  { %v244_v62 = vpop.f32.mrf.mxu0 }
 0x236   :  { %v245_v18 = vadd.f32 %v244_v62, %v140_v10  ;;  %v2629_v24 = vmax.f32 %v253_v12, 0.0 }
 0x237   :  { %v1935_v63 = vpop.f32.mrf.mxu0 }
 0x238   :  { %v256_v6 = vadd.f32 %v1935_v63, %v155_v0  ;;  %v2648_v31 = vmax.f32 %v245_v18, 0.0 }
 0x239   :  { %v247_v1 = vpop.f32.mrf.mxu0 }
 0x23a   :  { %v248_v14 = vadd.f32 %v247_v1, %v145_v7  ;;  %v2619_v19 = vmax.f32 %v256_v6, 0.0 }
 0x23b   :  { %v1938_v3 = vpop.f32.mrf.mxu0 }
 0x23c   :  { %v269_v5 = vadd.f32 %v1938_v3, %v170_v57  ;;  %v2634_v26 = vmax.f32 %v248_v14, 0.0  ;;  %v2119_v32 = vpack.i.bf16 %v2619_v19, %v2629_v24  ;;  %v384_v33 = vpack.c.bf16 %v2619_v19, %v2629_v24 }
 0x23d   :  { %v260_v4 = vpop.f32.mrf.mxu0 }
 0x23e   :  { %v261_v8 = vadd.f32 %v260_v4, %v160_v61  ;;  %v2615_v15 = vmax.f32 %v269_v5, 0.0  ;;  %v2124_v34 = vpack.i.bf16 %v2634_v26, %v2648_v31  ;;  %v383_v36 = vpack.c.bf16 %v2634_v26, %v2648_v31 }
 0x23f   :  { %v1939_v9 = vpop.f32.mrf.mxu0 }
 0x240   :  { %v272_v11 = vadd.f32 %v1939_v9, %v175_v58  ;;  %v2621_v20 = vmax.f32 %v261_v8, 0.0 }
 0x241   :  { %v263_v13 = vpop.f32.mrf.mxu0 }
 0x242   :  { %v2617_v16 = vmax.f32 %v272_v11, 0.0  ;;  %v264_v17 = vadd.f32 %v263_v13, %v165_v59 }
 0x244   :  { %v2623_v21 = vmax.f32 %v264_v17, 0.0  ;;  %v2109_v22 = vpack.i.bf16 %v2617_v16, %v2615_v15  ;;  %v386_v23 = vpack.c.bf16 %v2617_v16, %v2615_v15 }
 0x246   :  { %2110 = vrot.lane.b32.xlu1 %v2109_v22, %s2437_s26  ;;  %1940 = vmatprep.subr.bf16.mxu1 %v386_v23  ;;  %v2114_v27 = vpack.i.bf16 %v2623_v21, %v2621_v20  ;;  %v385_v28 = vpack.c.bf16 %v2623_v21, %v2621_v20 }
 0x247   :  { %1941 = vmatpush3.bf16.msra.mxu1 %v386_v23 }
 0x248   :  { %2115 = vrot.lane.b32.xlu0 %v2114_v27, %s2437_s26  ;;  %1942 = vmatprep.subr.bf16.mxu1 %v385_v28  ;;  %v547_v27 = vld [vmem:[%s3353_s6 + $0x38] sm:$0xff] }
 0x24a   :  { %2120 = vrot.lane.b32.xlu1 %v2119_v32, %s2437_s26  ;;  %v389_v32 = vld [vmem:[%s3351_s4 + $0x10] sm:$0xff] }
 0x24b   :  { %1943 = vmatpush3.bf16.msra.mxu1 %v385_v28  ;;  %v391_v28 = vld [vmem:[%s3351_s4 + $0x20] sm:$0xff] }
 0x24c   :  { %1944 = vmatprep.subr.bf16.mxu1 %v384_v33  ;;  %2125 = vrot.lane.b32.xlu0 %v2124_v34, %s2437_s26  ;;  %v542_v34 = vld [vmem:[%s3353_s6 + $0x10] sm:$0xff] }
 0x24f   :  { %1945 = vmatpush3.bf16.msra.mxu1 %v384_v33  ;;  %v390_v33 = vld [vmem:[%s3351_s4 + $0x18] sm:$0xff] }
 0x250   :  { %1946 = vmatprep.subr.bf16.mxu1 %v383_v36 }
 0x253   :  { %1947 = vmatpush3.bf16.msra.mxu1 %v383_v36  ;;  %v387_v36 = vld [vmem:[%s3351_s4] sm:$0xff] }
 0x2b8   :  { %v2111_v37 = vpop.permute.xlu1 %2110 }
 0x2b9   :  { %v2113_v38 = vunpack.i.h.bf16 %v2111_v37  ;;  %v2112_v39 = vunpack.i.l.bf16 %v2111_v37  ;;  %v388_v37 = vld [vmem:[%s3351_s4 + $0x8] sm:$0xff] }
 0x2ba   :  { %v2116_v40 = vpop.permute.xlu0 %2115 }
 0x2bb   :  { %v2118_v41 = vunpack.i.h.bf16 %v2116_v40  ;;  %v2117_v42 = vunpack.i.l.bf16 %v2116_v40  ;;  %v303_v43 = vsel %vm69_vm0, %v2112_v39, %v2615_v15  ;;  %v306_v45 = vsel %vm69_vm0, %v2113_v38, %v2617_v16  ;;  %v540_v38 = vld [vmem:[%s3353_s6] sm:$0xff]  ;;  %v541_v39 = vld [vmem:[%s3353_s6 + $0x8] sm:$0xff] }
 0x2bc   :  { %v2121_v46 = vpop.permute.xlu1 %2120  ;;  %v2129_v47 = vpack.i.bf16 %v306_v45, %v303_v43 }
 0x2bd   :  { %v2123_v49 = vunpack.i.h.bf16 %v2121_v46  ;;  %v2122_v50 = vunpack.i.l.bf16 %v2121_v46  ;;  %v297_v51 = vsel %vm69_vm0, %v2117_v42, %v2621_v20  ;;  %v300_v52 = vsel %vm69_vm0, %v2118_v41, %v2623_v21 }
 0x2be   :  { %2130 = vrot.lane.b32.xlu1 %v2129_v47, %s2437_s26  ;;  %v2126_v53 = vpop.permute.xlu0 %2125  ;;  %v2134_v54 = vpack.i.bf16 %v300_v52, %v297_v51 }
 0x2bf   :  { %v2128_v55 = vunpack.i.h.bf16 %v2126_v53  ;;  %v2127_v56 = vunpack.i.l.bf16 %v2126_v53  ;;  %v291_v57 = vsel %vm69_vm0, %v2122_v50, %v2629_v24  ;;  %v294_v58 = vsel %vm69_vm0, %v2123_v49, %v2619_v19 }
 0x2c0   :  { %2135 = vrot.lane.b32.xlu0 %v2134_v54, %s2437_s26  ;;  %v2139_v59 = vpack.i.bf16 %v294_v58, %v291_v57  ;;  %v2418_v58 = vld [vmem:[%s3352_s3 + $0x8] sm:$0xff]  }
 0x2c1   :  { %v285_v60 = vsel %vm69_vm0, %v2127_v56, %v2648_v31  ;;  %v288_v61 = vsel %vm69_vm0, %v2128_v55, %v2634_v26 }
 0x2c2   :  { %2140 = vrot.lane.b32.xlu1 %v2139_v59, %s2437_s26  ;;  %v2144_v62 = vpack.i.bf16 %v288_v61, %v285_v60  ;;  %v2419_v59 = vld [vmem:[%s3352_s3 + $0x10] sm:$0xff]   ;;  %v2420_v60 = vld [vmem:[%s3352_s3 + $0x18] sm:$0xff]   ;;  %s2440_s3 = smov 98  }
 0x2c4   :  { %2145 = vrot.lane.b32.xlu0 %v2144_v62, %s2437_s26 }
 0x330   :  { %v2131_v63 = vpop.permute.xlu1 %2130 }
 0x331   :  { %v2133_v0 = vunpack.i.h.bf16 %v2131_v63  ;;  %v2132_v1 = vunpack.i.l.bf16 %v2131_v63 }
 0x332   :  { %v2136_v2 = vpop.permute.xlu0 %2135 }
 0x333   :  { %v2138_v3 = vunpack.i.h.bf16 %v2136_v2  ;;  %v2137_v4 = vunpack.i.l.bf16 %v2136_v2  ;;  %v329_v5 = vsel %vm69_vm0, %v2132_v1, %v2615_v15  ;;  %v330_v6 = vsel %vm69_vm0, %v2133_v0, %v2617_v16 }
 0x334   :  { %v2141_v7 = vpop.permute.xlu1 %2140  ;;  %v2149_v8 = vpack.i.bf16 %v330_v6, %v329_v5 }
 0x335   :  { %v2143_v9 = vunpack.i.h.bf16 %v2141_v7  ;;  %v2142_v10 = vunpack.i.l.bf16 %v2141_v7  ;;  %v327_v11 = vsel %vm69_vm0, %v2137_v4, %v2621_v20  ;;  %v328_v12 = vsel %vm69_vm0, %v2138_v3, %v2623_v21  ;;  %v1970_v3 = vpop.f32.mrf.mxu0 }
 0x336   :  { %2150 = vrot.lane.b32.xlu1 %v2149_v8, %s2438_s28  ;;  %v2146_v13 = vpop.permute.xlu0 %2145  ;;  %v2154_v14 = vpack.i.bf16 %v328_v12, %v327_v11 }
 0x337   :  { %v2148_v17 = vunpack.i.h.bf16 %v2146_v13  ;;  %v2147_v18 = vunpack.i.l.bf16 %v2146_v13  ;;  %v325_v15 = vsel %vm69_vm0, %v2142_v10, %v2629_v24  ;;  %v326_v16 = vsel %vm69_vm0, %v2143_v9, %v2619_v19  ;;  %v393_v19 = vld [vmem:[%s3351_s4 + $0x30] sm:$0xff]  ;;  %v394_v24 = vld [vmem:[%s3351_s4 + $0x38] sm:$0xff]  ;;  %v655_v4 = vpop.f32.mrf.mxu0 }
 0x338   :  { %2155 = vrot.lane.b32.xlu0 %v2154_v14, %s2438_s28  ;;  %v2159_v22 = vpack.i.bf16 %v326_v16, %v325_v15 }
 0x339   :  { %v323_v20 = vsel %vm69_vm0, %v2147_v18, %v2648_v31  ;;  %v324_v21 = vsel %vm69_vm0, %v2148_v17, %v2634_v26  ;;  %v546_v26 = vld [vmem:[%s3353_s6 + $0x30] sm:$0xff]  ;;  %v545_v31 = vld [vmem:[%s3353_s6 + $0x28] sm:$0xff]  ;;  %v1971_v6 = vpop.f32.mrf.mxu0 }
 0x33a   :  { %2160 = vrot.lane.b32.xlu1 %v2159_v22, %s2438_s28  ;;  %v2164_v23 = vpack.i.bf16 %v324_v21, %v323_v20 }
 0x33b   :  { %v658_v9 = vpop.f32.mrf.mxu0 }
 0x33c   :  { %2165 = vrot.lane.b32.xlu0 %v2164_v23, %s2438_s28 }
 0x33d   :  { %v1974_v13 = vpop.f32.mrf.mxu0 }
 0x33e   :  { %427 = vperm.xlu1 %2108, %v393_v19  }
 0x33f   :  { %v671_v15 = vpop.f32.mrf.mxu0 }
 0x340   :  { %432 = vperm.xlu0 %2107, %v394_v24  }
 0x341   :  { %v1975_v24 = vpop.f32.mrf.mxu0 }
 0x342   :  { %580 = vperm.xlu1 %2108, %v546_v26  }
 0x344   :  { %585 = vperm.xlu0 %2107, %v547_v27  }
 0x346   :  { %417 = vperm.xlu1 %2108, %v391_v28  }
 0x348   :  { %422 = vperm.xlu0 %2107, %v392_v29  }
 0x34a   :  { %570 = vperm.xlu1 %2108, %v544_v30  }
 0x34c   :  { %575 = vperm.xlu0 %2107, %v545_v31  }
 0x34e   :  { %407 = vperm.xlu1 %2108, %v389_v32  }
 0x350   :  { %412 = vperm.xlu0 %2107, %v390_v33   ;;  %v674_v33 = vpop.f32.mrf.mxu0 }
 0x352   :  { %560 = vperm.xlu1 %2108, %v542_v34  }
 0x354   :  { %565 = vperm.xlu0 %2107, %v543_v35  }
 0x356   :  { %397 = vperm.xlu1 %2108, %v387_v36  }
 0x358   :  { %402 = vperm.xlu0 %2107, %v388_v37  }
 0x35a   :  { %550 = vperm.xlu1 %2108, %v540_v38  }
 0x35c   :  { %555 = vperm.xlu0 %2107, %v541_v39  }
 0x3a8   :  { %v2151_v40 = vpop.permute.xlu1 %2150 }
 0x3a9   :  { %v2153_v41 = vunpack.i.h.bf16 %v2151_v40  ;;  %v2152_v42 = vunpack.i.l.bf16 %v2151_v40 }
 0x3aa   :  { %v2156_v43 = vpop.permute.xlu0 %2155 }
 0x3ab   :  { %v1767_v45 = vpack.c.bf16 %v2153_v41, %v2152_v42  ;;  %v2158_v46 = vunpack.i.h.bf16 %v2156_v43  ;;  %v2157_v47 = vunpack.i.l.bf16 %v2156_v43 }
 0x3ac   :  { %v2161_v49 = vpop.permute.xlu1 %2160 }
 0x3ad   :  { %v1770_v50 = vpack.c.bf16 %v2158_v46, %v2157_v47  ;;  %v2163_v51 = vunpack.i.h.bf16 %v2161_v49  ;;  %v2162_v52 = vunpack.i.l.bf16 %v2161_v49  ;;  %1948 = vmatprep.subr.msk.bf16.mxu1 %vm2587_vm3, %v1767_v45 }
 0x3ae   :  { %v2166_v53 = vpop.permute.xlu0 %2165  ;;  %1949 = vmatpush3.bf16.msk.msra.mxu1 %vm2587_vm3, %v1767_v45 }
 0x3af   :  { %1950 = vmatprep.subr.msk.bf16.mxu1 %vm2587_vm3, %v1770_v50  ;;  %v1773_v54 = vpack.c.bf16 %v2163_v51, %v2162_v52  ;;  %v2168_v55 = vunpack.i.h.bf16 %v2166_v53  ;;  %v2167_v56 = vunpack.i.l.bf16 %v2166_v53 }
 0x3b1   :  { %v1776_v57 = vpack.c.bf16 %v2168_v55, %v2167_v56 }
 0x3b2   :  { %1951 = vmatpush3.bf16.msk.msra.mxu1 %vm2587_vm3, %v1770_v50 }
 0x3b3   :  { %1952 = vmatprep.subr.msk.bf16.mxu1 %vm2587_vm3, %v1773_v54 }
 0x3b6   :  { %1953 = vmatpush3.bf16.msk.msra.mxu1 %vm2587_vm3, %v1773_v54 }
 0x3b7   :  { %1954 = vmatprep.subr.msk.bf16.mxu1 %vm2587_vm3, %v1776_v57 }
 0x3b9   :  { %v428_v62 = vpop.permute.xlu1 %427 }
 0x3ba   :  { %1955 = vmatpush3.bf16.msk.msra.mxu1 %vm2587_vm3, %v1776_v57 }
 0x3bb   :  { %v433_v61 = vpop.permute.xlu0 %432 }
 0x3bd   :  { %1957 = vmatmul.mubr.bf16.vlgmr.msra.gmra.mxu1 %v2418_v58  ;;  %v581_v0 = vpop.permute.xlu1 %580 }
 0x3be   :  { %1960 = vmatprep.mubr.bf16.mxu1 %v2419_v59  ;;  %v680_v32 = vadd.f32 %v1974_v13, %v581_v0 }
 0x3bf   :  { %v586_v63 = vpop.permute.xlu0 %585 }
 0x3c0   :  { %v683_v36 = vadd.f32 %v1975_v24, %v586_v63 }
 0x3c1   :  { %v418_v2 = vpop.permute.xlu1 %417 }
 0x3c3   :  { %v423_v1 = vpop.permute.xlu0 %422 }
 0x3c5   :  { %1961 = vmatmul.mubr.bf16.gmra.mxu1 %v2420_v60  ;;  %v571_v5 = vpop.permute.xlu1 %570 }
 0x3c6   :  { %v672_v37 = vadd.f32 %v671_v15, %v571_v5 }
 0x3c7   :  { %v576_v48 = vpop.permute.xlu0 %575 }
 0x3c8   :  { %v675_v49 = vadd.f32 %v674_v33, %v576_v48 }
 0x3c9   :  { %v408_v8 = vpop.permute.xlu1 %407 }
 0x3cb   :  { %v413_v7 = vpop.permute.xlu0 %412 }
 0x3cd   :  { %v561_v14 = vpop.permute.xlu1 %560 }
 0x3ce   :  { %v664_v50 = vadd.f32 %v1970_v3, %v561_v14 }
 0x3cf   :  { %v566_v11 = vpop.permute.xlu0 %565 }
 0x3d0   :  { %v667_v38 = vadd.f32 %v1971_v6, %v566_v11 }
 0x3d1   :  { %v398_v21 = vpop.permute.xlu1 %397 }
 0x3d3   :  { %v403_v16 = vpop.permute.xlu0 %402 }
 0x3d5   :  { %v551_v42 = vpop.permute.xlu1 %550 }
 0x3d6   :  { %v656_v57 = vadd.f32 %v655_v4, %v551_v42 }
 0x3d7   :  { %v556_v39 = vpop.permute.xlu0 %555 }
 0x3d8   :  { %v659_v53 = vadd.f32 %v658_v9, %v556_v39 }
 0x47d   :  { %v1958_v10 = vpop.f32.mrf.mxu1 }
 0x47e   :  { %v502_v25 = vadd.f32 %v1958_v10, %v408_v8 }
 0x47f   :  { %v493_v12 = vpop.f32.mrf.mxu1 }
 0x480   :  { %v494_v29 = vadd.f32 %v493_v12, %v398_v21  ;;  %v526_v40 = vmax.f32 %v502_v25, 0.0 }
 0x481   :  { %v1959_v17 = vpop.f32.mrf.mxu1 }
 0x482   :  { %v505_v22 = vadd.f32 %v1959_v17, %v413_v7  ;;  %v524_v51 = vmax.f32 %v494_v29, 0.0  ;;  %v688_v58 = vadd.f32 %v664_v50, %v526_v40 }
 0x483   :  { %v496_v18 = vpop.f32.mrf.mxu1 }
 0x484   :  { %v497_v26 = vadd.f32 %v496_v18, %v403_v16  ;;  %v527_v30 = vmax.f32 %v505_v22, 0.0  ;;  %v686_v63 = vadd.f32 %v656_v57, %v524_v51  ;;  %v2797_v4 = vmax.f32 %v688_v58, 0.0 }
 0x485   :  { %v1962_v20 = vpop.f32.mrf.mxu1 }
 0x486   :  { %v518_v23 = vadd.f32 %v1962_v20, %v428_v62  ;;  %v525_v43 = vmax.f32 %v497_v26, 0.0  ;;  %v689_v52 = vadd.f32 %v667_v38, %v527_v30  ;;  %v2806_v8 = vmax.f32 %v686_v63, 0.0 }
 0x487   :  { %v509_v19 = vpop.f32.mrf.mxu1 }
 0x488   :  { %v530_v27 = vmax.f32 %v518_v23, 0.0  ;;  %v510_v28 = vadd.f32 %v509_v19, %v418_v2  ;;  %v687_v59 = vadd.f32 %v659_v53, %v525_v43  ;;  %v2787_v0 = vmax.f32 %v689_v52, 0.0 }
 0x489   :  { %v1963_v31 = vpop.f32.mrf.mxu1 }
 0x48a   :  { %v528_v34 = vmax.f32 %v510_v28, 0.0  ;;  %v521_v35 = vadd.f32 %v1963_v31, %v433_v61  ;;  %v692_v45 = vadd.f32 %v680_v32, %v530_v27  ;;  %v2799_v5 = vmax.f32 %v687_v59, 0.0 }
 0x48b   :  { %v512_v41 = vpop.f32.mrf.mxu1  ;;  %v2179_v9 = vpack.i.bf16 %v2787_v0, %v2797_v4  ;;  %v806_v10 = vpack.c.bf16 %v2787_v0, %v2797_v4 }
 0x48c   :  { %v531_v46 = vmax.f32 %v521_v35, 0.0  ;;  %v513_v47 = vadd.f32 %v512_v41, %v423_v1  ;;  %v690_v54 = vadd.f32 %v672_v37, %v528_v34  ;;  %v2783_v60 = vmax.f32 %v692_v45, 0.0 }
 0x48d   :  { %v2184_v11 = vpack.i.bf16 %v2799_v5, %v2806_v8  ;;  %v805_v12 = vpack.c.bf16 %v2799_v5, %v2806_v8 }
 0x48e   :  { %v693_v55 = vadd.f32 %v683_v36, %v531_v46  ;;  %v529_v56 = vmax.f32 %v513_v47, 0.0  ;;  %v2789_v1 = vmax.f32 %v690_v54, 0.0 }
 0x490   :  { %v2785_v61 = vmax.f32 %v693_v55, 0.0  ;;  %v691_v62 = vadd.f32 %v675_v49, %v529_v56 }
 0x492   :  { %v2791_v2 = vmax.f32 %v691_v62, 0.0  ;;  %v2169_v3 = vpack.i.bf16 %v2785_v61, %v2783_v60  ;;  %v808_v48 = vpack.c.bf16 %v2785_v61, %v2783_v60 }
 0x494   :  { %2170 = vrot.lane.b32.xlu1 %v2169_v3, %s2437_s26  ;;  %1976 = vmatprep.subr.bf16.mxu0 %v808_v48  ;;  %v2174_v6 = vpack.i.bf16 %v2791_v2, %v2789_v1  ;;  %v807_v7 = vpack.c.bf16 %v2791_v2, %v2789_v1 }
 0x495   :  { %1977 = vmatpush3.bf16.msra.mxu0 %v808_v48  ;;  %v815_v48 = vld [vmem:[%s3354_s8 + $0x30] sm:$0xff] }
 0x496   :  { %2175 = vrot.lane.b32.xlu0 %v2174_v6, %s2437_s26  ;;  %1978 = vmatprep.subr.bf16.mxu0 %v807_v7  ;;  %v2421_v6 = vld [vmem:[%s3355_s7] sm:$0xff]  }
 0x497   :  { %1992 = vmatprep.mubr.bf16.mxu0 %v2421_v6 }
 0x498   :  { %2180 = vrot.lane.b32.xlu1 %v2179_v9, %s2437_s26  ;;  %v813_v9 = vld [vmem:[%s3354_s8 + $0x20] sm:$0xff] }
 0x499   :  { %1979 = vmatpush3.bf16.msra.mxu0 %v807_v7  ;;  %v816_v7 = vld [vmem:[%s3354_s8 + $0x38] sm:$0xff] }
 0x49a   :  { %1980 = vmatprep.subr.bf16.mxu0 %v806_v10  ;;  %2185 = vrot.lane.b32.xlu0 %v2184_v11, %s2437_s26  ;;  %v811_v11 = vld [vmem:[%s3354_s8 + $0x10] sm:$0xff] }
 0x49d   :  { %1981 = vmatpush3.bf16.msra.mxu0 %v806_v10  ;;  %v814_v10 = vld [vmem:[%s3354_s8 + $0x28] sm:$0xff] }
 0x49e   :  { %1982 = vmatprep.subr.bf16.mxu0 %v805_v12 }
 0x4a1   :  { %1983 = vmatpush3.bf16.msra.mxu0 %v805_v12  ;;  %v812_v12 = vld [vmem:[%s3354_s8 + $0x18] sm:$0xff] }
 0x506   :  { %v2171_v13 = vpop.permute.xlu1 %2170 }
 0x507   :  { %v2173_v14 = vunpack.i.h.bf16 %v2171_v13  ;;  %v2172_v17 = vunpack.i.l.bf16 %v2171_v13  ;;  %v809_v13 = vld [vmem:[%s3354_s8] sm:$0xff] }
 0x508   :  { %v2176_v18 = vpop.permute.xlu0 %2175 }
 0x509   :  { %v2178_v15 = vunpack.i.h.bf16 %v2176_v18  ;;  %v2177_v16 = vunpack.i.l.bf16 %v2176_v18  ;;  %v722_v22 = vsel %vm69_vm0, %v2172_v17, %v2783_v60  ;;  %v725_v20 = vsel %vm69_vm0, %v2173_v14, %v2785_v61  ;;  %v810_v14 = vld [vmem:[%s3354_s8 + $0x8] sm:$0xff] }
 0x50a   :  { %v2181_v21 = vpop.permute.xlu1 %2180  ;;  %v2189_v23 = vpack.i.bf16 %v725_v20, %v722_v22 }
 0x50b   :  { %v2183_v25 = vunpack.i.h.bf16 %v2181_v21  ;;  %v2182_v19 = vunpack.i.l.bf16 %v2181_v21  ;;  %v716_v24 = vsel %vm69_vm0, %v2177_v16, %v2789_v1  ;;  %v719_v26 = vsel %vm69_vm0, %v2178_v15, %v2791_v2 }
 0x50c   :  { %2190 = vrot.lane.b32.xlu1 %v2189_v23, %s2437_s26  ;;  %v2186_v27 = vpop.permute.xlu0 %2185  ;;  %v2194_v28 = vpack.i.bf16 %v719_v26, %v716_v24 }
 0x50d   :  { %v2188_v29 = vunpack.i.h.bf16 %v2186_v27  ;;  %v2187_v30 = vunpack.i.l.bf16 %v2186_v27  ;;  %v710_v31 = vsel %vm69_vm0, %v2182_v19, %v2797_v4  ;;  %v713_v32 = vsel %vm69_vm0, %v2183_v25, %v2787_v0 }
 0x50e   :  { %2195 = vrot.lane.b32.xlu0 %v2194_v28, %s2437_s26  ;;  %v2199_v33 = vpack.i.bf16 %v713_v32, %v710_v31  ;;  %v2422_v32 = vld [vmem:[%s3355_s7 + $0x8] sm:$0xff]  }
 0x50f   :  { %v704_v34 = vsel %vm69_vm0, %v2187_v30, %v2806_v8  ;;  %v707_v35 = vsel %vm69_vm0, %v2188_v29, %v2799_v5 }
 0x510   :  { %2200 = vrot.lane.b32.xlu1 %v2199_v33, %s2437_s26  ;;  %v2204_v36 = vpack.i.bf16 %v707_v35, %v704_v34  ;;  %v2423_v33 = vld [vmem:[%s3355_s7 + $0x10] sm:$0xff]   ;;  %v2424_v34 = vld [vmem:[%s3355_s7 + $0x18] sm:$0xff]  }
 0x512   :  { %2205 = vrot.lane.b32.xlu0 %v2204_v36, %s2437_s26 }
 0x57e   :  { %v2191_v37 = vpop.permute.xlu1 %2190 }
 0x57f   :  { %v2193_v38 = vunpack.i.h.bf16 %v2191_v37  ;;  %v2192_v39 = vunpack.i.l.bf16 %v2191_v37 }
 0x580   :  { %v2196_v40 = vpop.permute.xlu0 %2195 }
 0x581   :  { %v2198_v41 = vunpack.i.h.bf16 %v2196_v40  ;;  %v2197_v42 = vunpack.i.l.bf16 %v2196_v40  ;;  %v748_v43 = vsel %vm69_vm0, %v2192_v39, %v2783_v60  ;;  %v749_v45 = vsel %vm69_vm0, %v2193_v38, %v2785_v61 }
 0x582   :  { %v2201_v46 = vpop.permute.xlu1 %2200  ;;  %v2209_v47 = vpack.i.bf16 %v749_v45, %v748_v43 }
 0x583   :  { %v2203_v49 = vunpack.i.h.bf16 %v2201_v46  ;;  %v2202_v50 = vunpack.i.l.bf16 %v2201_v46  ;;  %v746_v51 = vsel %vm69_vm0, %v2197_v42, %v2789_v1  ;;  %v747_v52 = vsel %vm69_vm0, %v2198_v41, %v2791_v2 }
 0x584   :  { %2210 = vrot.lane.b32.xlu1 %v2209_v47, %s2440_s3  ;;  %v2206_v53 = vpop.permute.xlu0 %2205  ;;  %v2214_v54 = vpack.i.bf16 %v747_v52, %v746_v51 }
 0x585   :  { %v2208_v55 = vunpack.i.h.bf16 %v2206_v53  ;;  %v2207_v56 = vunpack.i.l.bf16 %v2206_v53  ;;  %v744_v57 = vsel %vm69_vm0, %v2202_v50, %v2797_v4  ;;  %v745_v58 = vsel %vm69_vm0, %v2203_v49, %v2787_v0 }
 0x586   :  { %2215 = vrot.lane.b32.xlu0 %v2214_v54, %s2440_s3  ;;  %v2219_v59 = vpack.i.bf16 %v745_v58, %v744_v57 }
 0x587   :  { %v742_v62 = vsel %vm69_vm0, %v2207_v56, %v2806_v8  ;;  %v743_v63 = vsel %vm69_vm0, %v2208_v55, %v2799_v5 }
 0x588   :  { %2220 = vrot.lane.b32.xlu1 %v2219_v59, %s2440_s3  ;;  %v2224_v3 = vpack.i.bf16 %v743_v63, %v742_v62 }
 0x58a   :  { %2225 = vrot.lane.b32.xlu0 %v2224_v3, %s2440_s3 }
 0x58c   :  { %849 = vperm.xlu1 %2108, %v815_v48  }
 0x58e   :  { %854 = vperm.xlu0 %2107, %v816_v7  }
 0x590   :  { %839 = vperm.xlu1 %2108, %v813_v9  }
 0x592   :  { %844 = vperm.xlu0 %2107, %v814_v10  }
 0x594   :  { %829 = vperm.xlu1 %2108, %v811_v11  }
 0x596   :  { %834 = vperm.xlu0 %2107, %v812_v12  }
 0x598   :  { %819 = vperm.xlu1 %2108, %v809_v13  }
 0x59a   :  { %824 = vperm.xlu0 %2107, %v810_v14  }
 0x5f6   :  { %v2211_v17 = vpop.permute.xlu1 %2210 }
 0x5f7   :  { %v2213_v18 = vunpack.i.h.bf16 %v2211_v17  ;;  %v2212_v15 = vunpack.i.l.bf16 %v2211_v17 }
 0x5f8   :  { %v2216_v22 = vpop.permute.xlu0 %2215 }
 0x5f9   :  { %v1791_v20 = vpack.c.bf16 %v2213_v18, %v2212_v15  ;;  %v2218_v21 = vunpack.i.h.bf16 %v2216_v22  ;;  %v2217_v23 = vunpack.i.l.bf16 %v2216_v22 }
 0x5fa   :  { %v2221_v25 = vpop.permute.xlu1 %2220 }
 0x5fb   :  { %v1794_v19 = vpack.c.bf16 %v2218_v21, %v2217_v23  ;;  %v2223_v24 = vunpack.i.h.bf16 %v2221_v25  ;;  %v2222_v26 = vunpack.i.l.bf16 %v2221_v25  ;;  %1984 = vmatprep.subr.msk.bf16.mxu0 %vm2887_vm6, %v1791_v20 }
 0x5fc   :  { %v2226_v27 = vpop.permute.xlu0 %2225  ;;  %1985 = vmatpush3.bf16.msk.msra.mxu0 %vm2887_vm6, %v1791_v20 }
 0x5fd   :  { %1986 = vmatprep.subr.msk.bf16.mxu0 %vm2887_vm6, %v1794_v19  ;;  %v1797_v28 = vpack.c.bf16 %v2223_v24, %v2222_v26  ;;  %v2228_v29 = vunpack.i.h.bf16 %v2226_v27  ;;  %v2227_v30 = vunpack.i.l.bf16 %v2226_v27 }
 0x5ff   :  { %v1800_v31 = vpack.c.bf16 %v2228_v29, %v2227_v30 }
 0x600   :  { %1987 = vmatpush3.bf16.msk.msra.mxu0 %vm2887_vm6, %v1794_v19 }
 0x601   :  { %1988 = vmatprep.subr.msk.bf16.mxu0 %vm2887_vm6, %v1797_v28 }
 0x604   :  { %1989 = vmatpush3.bf16.msk.msra.mxu0 %vm2887_vm6, %v1797_v28 }
 0x605   :  { %1990 = vmatprep.subr.msk.bf16.mxu0 %vm2887_vm6, %v1800_v31 }
 0x607   :  { %v850_v36 = vpop.permute.xlu1 %849 }
 0x608   :  { %1991 = vmatpush3.bf16.msk.msra.mxu0 %vm2887_vm6, %v1800_v31 }
 0x609   :  { %v855_v35 = vpop.permute.xlu0 %854 }
 0x60b   :  { %1993 = vmatmul.mubr.bf16.vlgmr.msra.gmra.mxu0 %v2422_v32  ;;  %v840_v40 = vpop.permute.xlu1 %839 }
 0x60c   :  { %1996 = vmatprep.mubr.bf16.mxu0 %v2423_v33 }
 0x60d   :  { %v845_v38 = vpop.permute.xlu0 %844 }
 0x60f   :  { %v830_v46 = vpop.permute.xlu1 %829 }
 0x611   :  { %v835_v43 = vpop.permute.xlu0 %834 }
 0x613   :  { %1997 = vmatmul.mubr.bf16.gmra.mxu0 %v2424_v34  ;;  %v820_v57 = vpop.permute.xlu1 %819 }
 0x615   :  { %v825_v54 = vpop.permute.xlu0 %824 }
 0x6cb   :  { %v1994_v37 = vpop.f32.mrf.mxu0 }
 0x6cc   :  { %v924_v55 = vadd.f32 %v1994_v37, %v830_v46 }
 0x6cd   :  { %v915_v39 = vpop.f32.mrf.mxu0 }
 0x6ce   :  { %v916_v3 = vadd.f32 %v915_v39, %v820_v57  ;;  %v2930_v11 = vmax.f32 %v924_v55, 0.0 }
 0x6cf   :  { %v1995_v41 = vpop.f32.mrf.mxu0 }
 0x6d0   :  { %v927_v50 = vadd.f32 %v1995_v41, %v835_v43  ;;  %v2939_v17 = vmax.f32 %v916_v3, 0.0 }
 0x6d1   :  { %v918_v42 = vpop.f32.mrf.mxu0 }
 0x6d2   :  { %v919_v58 = vadd.f32 %v918_v42, %v825_v54  ;;  %v2920_v48 = vmax.f32 %v927_v50, 0.0 }
 0x6d3   :  { %v1998_v45 = vpop.f32.mrf.mxu0 }
 0x6d4   :  { %v940_v49 = vadd.f32 %v1998_v45, %v850_v36  ;;  %v2932_v12 = vmax.f32 %v919_v58, 0.0  ;;  %v2239_v18 = vpack.i.bf16 %v2920_v48, %v2930_v11  ;;  %v1055_v15 = vpack.c.bf16 %v2920_v48, %v2930_v11 }
 0x6d5   :  { %v931_v47 = vpop.f32.mrf.mxu0 }
 0x6d6   :  { %v932_v52 = vadd.f32 %v931_v47, %v840_v40  ;;  %v2916_v59 = vmax.f32 %v940_v49, 0.0  ;;  %v2244_v22 = vpack.i.bf16 %v2932_v12, %v2939_v17  ;;  %v1054_v20 = vpack.c.bf16 %v2932_v12, %v2939_v17 }
 0x6d7   :  { %v1999_v51 = vpop.f32.mrf.mxu0 }
 0x6d8   :  { %v943_v53 = vadd.f32 %v1999_v51, %v855_v35  ;;  %v2922_v6 = vmax.f32 %v932_v52, 0.0 }
 0x6d9   :  { %v934_v56 = vpop.f32.mrf.mxu0 }
 0x6da   :  { %v2918_v62 = vmax.f32 %v943_v53, 0.0  ;;  %v935_v63 = vadd.f32 %v934_v56, %v845_v38 }
 0x6dc   :  { %v2924_v7 = vmax.f32 %v935_v63, 0.0  ;;  %v2229_v9 = vpack.i.bf16 %v2918_v62, %v2916_v59  ;;  %v1057_v10 = vpack.c.bf16 %v2918_v62, %v2916_v59 }
 0x6de   :  { %2230 = vrot.lane.b32.xlu1 %v2229_v9, %s2437_s26  ;;  %2000 = vmatprep.subr.bf16.mxu1 %v1057_v10  ;;  %v2234_v13 = vpack.i.bf16 %v2924_v7, %v2922_v6  ;;  %v1056_v14 = vpack.c.bf16 %v2924_v7, %v2922_v6 }
 0x6df   :  { %2001 = vmatpush3.bf16.msra.mxu1 %v1057_v10 }
 0x6e0   :  { %2235 = vrot.lane.b32.xlu0 %v2234_v13, %s2437_s26  ;;  %2002 = vmatprep.subr.bf16.mxu1 %v1056_v14 }
 0x6e2   :  { %2240 = vrot.lane.b32.xlu1 %v2239_v18, %s2437_s26 }
 0x6e3   :  { %2003 = vmatpush3.bf16.msra.mxu1 %v1056_v14 }
 0x6e4   :  { %2004 = vmatprep.subr.bf16.mxu1 %v1055_v15  ;;  %2245 = vrot.lane.b32.xlu0 %v2244_v22, %s2437_s26  ;;  %v1064_v22 = vld [vmem:[%s3356_s10 + $0x30] sm:$0xff] }
 0x6e7   :  { %2005 = vmatpush3.bf16.msra.mxu1 %v1055_v15 }
 0x6e8   :  { %2006 = vmatprep.subr.bf16.mxu1 %v1054_v20 }
 0x6eb   :  { %2007 = vmatpush3.bf16.msra.mxu1 %v1054_v20  ;;  %v1060_v20 = vld [vmem:[%s3356_s10 + $0x10] sm:$0xff] }
 0x750   :  { %v2231_v21 = vpop.permute.xlu1 %2230 }
 0x751   :  { %v2233_v23 = vunpack.i.h.bf16 %v2231_v21  ;;  %v2232_v25 = vunpack.i.l.bf16 %v2231_v21  ;;  %v1061_v21 = vld [vmem:[%s3356_s10 + $0x18] sm:$0xff] }
 0x752   :  { %v2236_v19 = vpop.permute.xlu0 %2235 }
 0x753   :  { %v2238_v24 = vunpack.i.h.bf16 %v2236_v19  ;;  %v2237_v26 = vunpack.i.l.bf16 %v2236_v19  ;;  %v974_v27 = vsel %vm69_vm0, %v2232_v25, %v2916_v59  ;;  %v977_v28 = vsel %vm69_vm0, %v2233_v23, %v2918_v62  ;;  %v1058_v23 = vld [vmem:[%s3356_s10] sm:$0xff]  ;;  %v1059_v25 = vld [vmem:[%s3356_s10 + $0x8] sm:$0xff] }
 0x754   :  { %v2241_v29 = vpop.permute.xlu1 %2240  ;;  %v2249_v30 = vpack.i.bf16 %v977_v28, %v974_v27 }
 0x755   :  { %v2243_v31 = vunpack.i.h.bf16 %v2241_v29  ;;  %v2242_v32 = vunpack.i.l.bf16 %v2241_v29  ;;  %v968_v33 = vsel %vm69_vm0, %v2237_v26, %v2922_v6  ;;  %v971_v34 = vsel %vm69_vm0, %v2238_v24, %v2924_v7 }
 0x756   :  { %2250 = vrot.lane.b32.xlu1 %v2249_v30, %s2437_s26  ;;  %v2246_v35 = vpop.permute.xlu0 %2245  ;;  %v2254_v36 = vpack.i.bf16 %v971_v34, %v968_v33 }
 0x757   :  { %v2248_v37 = vunpack.i.h.bf16 %v2246_v35  ;;  %v2247_v38 = vunpack.i.l.bf16 %v2246_v35  ;;  %v962_v39 = vsel %vm69_vm0, %v2242_v32, %v2930_v11  ;;  %v965_v40 = vsel %vm69_vm0, %v2243_v31, %v2920_v48 }
 0x758   :  { %2255 = vrot.lane.b32.xlu0 %v2254_v36, %s2437_s26  ;;  %v2259_v41 = vpack.i.bf16 %v965_v40, %v962_v39  ;;  %v2426_v40 = vld [vmem:[%s3357_s9 + $0x8] sm:$0xff]  }
 0x759   :  { %v956_v42 = vsel %vm69_vm0, %v2247_v38, %v2939_v17  ;;  %v959_v43 = vsel %vm69_vm0, %v2248_v37, %v2932_v12 }
 0x75a   :  { %2260 = vrot.lane.b32.xlu1 %v2259_v41, %s2437_s26  ;;  %v2264_v45 = vpack.i.bf16 %v959_v43, %v956_v42  ;;  %v2427_v41 = vld [vmem:[%s3357_s9 + $0x10] sm:$0xff]   ;;  %v2428_v42 = vld [vmem:[%s3357_s9 + $0x18] sm:$0xff]  }
 0x75c   :  { %2265 = vrot.lane.b32.xlu0 %v2264_v45, %s2437_s26 }
 0x7c8   :  { %v2251_v46 = vpop.permute.xlu1 %2250 }
 0x7c9   :  { %v2253_v47 = vunpack.i.h.bf16 %v2251_v46  ;;  %v2252_v49 = vunpack.i.l.bf16 %v2251_v46 }
 0x7ca   :  { %v2256_v50 = vpop.permute.xlu0 %2255 }
 0x7cb   :  { %v2258_v51 = vunpack.i.h.bf16 %v2256_v50  ;;  %v2257_v52 = vunpack.i.l.bf16 %v2256_v50  ;;  %v1000_v53 = vsel %vm69_vm0, %v2252_v49, %v2916_v59  ;;  %v1001_v54 = vsel %vm69_vm0, %v2253_v47, %v2918_v62 }
 0x7cc   :  { %v2261_v55 = vpop.permute.xlu1 %2260  ;;  %v2269_v56 = vpack.i.bf16 %v1001_v54, %v1000_v53 }
 0x7cd   :  { %v2263_v57 = vunpack.i.h.bf16 %v2261_v55  ;;  %v2262_v58 = vunpack.i.l.bf16 %v2261_v55  ;;  %v998_v63 = vsel %vm69_vm0, %v2257_v52, %v2922_v6  ;;  %v999_v3 = vsel %vm69_vm0, %v2258_v51, %v2924_v7 }
 0x7ce   :  { %2270 = vrot.lane.b32.xlu1 %v2269_v56, %s2440_s3  ;;  %v2266_v9 = vpop.permute.xlu0 %2265  ;;  %v2274_v10 = vpack.i.bf16 %v999_v3, %v998_v63 }
 0x7cf   :  { %v2268_v13 = vunpack.i.h.bf16 %v2266_v9  ;;  %v2267_v14 = vunpack.i.l.bf16 %v2266_v9  ;;  %v996_v59 = vsel %vm69_vm0, %v2262_v58, %v2930_v11  ;;  %v997_v62 = vsel %vm69_vm0, %v2263_v57, %v2920_v48  ;;  %v2425_v48 = vld [vmem:[%s3357_s9] sm:$0xff]   ;;  %v1065_v11 = vld [vmem:[%s3356_s10 + $0x38] sm:$0xff]  ;;  %s2441_s9 = smov 100  }
 0x7d0   :  { %2275 = vrot.lane.b32.xlu0 %v2274_v10, %s2440_s3  ;;  %v2279_v18 = vpack.i.bf16 %v997_v62, %v996_v59  ;;  %2016 = vmatprep.mubr.bf16.mxu1 %v2425_v48 }
 0x7d1   :  { %v994_v6 = vsel %vm69_vm0, %v2267_v14, %v2939_v17  ;;  %v995_v7 = vsel %vm69_vm0, %v2268_v13, %v2932_v12  ;;  %v1062_v12 = vld [vmem:[%s3356_s10 + $0x20] sm:$0xff]  ;;  %v1063_v17 = vld [vmem:[%s3356_s10 + $0x28] sm:$0xff] }
 0x7d2   :  { %2280 = vrot.lane.b32.xlu1 %v2279_v18, %s2440_s3  ;;  %v2284_v15 = vpack.i.bf16 %v995_v7, %v994_v6 }
 0x7d4   :  { %2285 = vrot.lane.b32.xlu0 %v2284_v15, %s2440_s3 }
 0x7d6   :  { %1098 = vperm.xlu1 %2108, %v1064_v22  }
 0x7d8   :  { %1103 = vperm.xlu0 %2107, %v1065_v11  }
 0x7da   :  { %1088 = vperm.xlu1 %2108, %v1062_v12  }
 0x7dc   :  { %1093 = vperm.xlu0 %2107, %v1063_v17  }
 0x7de   :  { %1078 = vperm.xlu1 %2108, %v1060_v20  }
 0x7e0   :  { %1083 = vperm.xlu0 %2107, %v1061_v21  }
 0x7e2   :  { %1068 = vperm.xlu1 %2108, %v1058_v23  }
 0x7e4   :  { %1073 = vperm.xlu0 %2107, %v1059_v25  }
 0x840   :  { %v2271_v19 = vpop.permute.xlu1 %2270 }
 0x841   :  { %v2273_v24 = vunpack.i.h.bf16 %v2271_v19  ;;  %v2272_v26 = vunpack.i.l.bf16 %v2271_v19 }
 0x842   :  { %v2276_v27 = vpop.permute.xlu0 %2275 }
 0x843   :  { %v1807_v28 = vpack.c.bf16 %v2273_v24, %v2272_v26  ;;  %v2278_v29 = vunpack.i.h.bf16 %v2276_v27  ;;  %v2277_v30 = vunpack.i.l.bf16 %v2276_v27 }
 0x844   :  { %v2281_v31 = vpop.permute.xlu1 %2280 }
 0x845   :  { %v1810_v32 = vpack.c.bf16 %v2278_v29, %v2277_v30  ;;  %v2283_v33 = vunpack.i.h.bf16 %v2281_v31  ;;  %v2282_v34 = vunpack.i.l.bf16 %v2281_v31  ;;  %2008 = vmatprep.subr.msk.bf16.mxu1 %vm2887_vm6, %v1807_v28 }
 0x846   :  { %v2286_v35 = vpop.permute.xlu0 %2285  ;;  %2009 = vmatpush3.bf16.msk.msra.mxu1 %vm2887_vm6, %v1807_v28 }
 0x847   :  { %2010 = vmatprep.subr.msk.bf16.mxu1 %vm2887_vm6, %v1810_v32  ;;  %v1813_v36 = vpack.c.bf16 %v2283_v33, %v2282_v34  ;;  %v2288_v37 = vunpack.i.h.bf16 %v2286_v35  ;;  %v2287_v38 = vunpack.i.l.bf16 %v2286_v35 }
 0x849   :  { %v1816_v39 = vpack.c.bf16 %v2288_v37, %v2287_v38 }
 0x84a   :  { %2011 = vmatpush3.bf16.msk.msra.mxu1 %vm2887_vm6, %v1810_v32 }
 0x84b   :  { %2012 = vmatprep.subr.msk.bf16.mxu1 %vm2887_vm6, %v1813_v36 }
 0x84e   :  { %2013 = vmatpush3.bf16.msk.msra.mxu1 %vm2887_vm6, %v1813_v36 }
 0x84f   :  { %2014 = vmatprep.subr.msk.bf16.mxu1 %vm2887_vm6, %v1816_v39 }
 0x851   :  { %v1099_v45 = vpop.permute.xlu1 %1098 }
 0x852   :  { %2015 = vmatpush3.bf16.msk.msra.mxu1 %vm2887_vm6, %v1816_v39 }
 0x853   :  { %v1104_v43 = vpop.permute.xlu0 %1103 }
 0x855   :  { %2017 = vmatmul.mubr.bf16.vlgmr.msra.gmra.mxu1 %v2426_v40  ;;  %v1089_v47 = vpop.permute.xlu1 %1088 }
 0x856   :  { %2020 = vmatprep.mubr.bf16.mxu1 %v2427_v41 }
 0x857   :  { %v1094_v46 = vpop.permute.xlu0 %1093 }
 0x859   :  { %v1079_v52 = vpop.permute.xlu1 %1078 }
 0x85b   :  { %v1084_v51 = vpop.permute.xlu0 %1083 }
 0x85d   :  { %2021 = vmatmul.mubr.bf16.gmra.mxu1 %v2428_v42  ;;  %v1069_v3 = vpop.permute.xlu1 %1068 }
 0x85f   :  { %v1074_v57 = vpop.permute.xlu0 %1073 }
 0x915   :  { %v2018_v49 = vpop.f32.mrf.mxu1 }
 0x916   :  { %v1173_v58 = vadd.f32 %v2018_v49, %v1079_v52 }
 0x917   :  { %v1164_v50 = vpop.f32.mrf.mxu1 }
 0x918   :  { %v1165_v14 = vadd.f32 %v1164_v50, %v1069_v3  ;;  %v1197_v7 = vmax.f32 %v1173_v58, 0.0 }
 0x919   :  { %v2019_v16 = vpop.f32.mrf.mxu1 }
 0x91a   :  { %v1176_v54 = vadd.f32 %v2019_v16, %v1084_v51  ;;  %v1195_v17 = vmax.f32 %v1165_v14, 0.0  ;;  %v1205_v19 = vadd.f32 %v1197_v7, %v2797_v4 }
 0x91b   :  { %v1167_v53 = vpop.f32.mrf.mxu1 }
 0x91c   :  { %v1168_v9 = vadd.f32 %v1167_v53, %v1074_v57  ;;  %v1198_v59 = vmax.f32 %v1176_v54, 0.0  ;;  %v1203_v28 = vadd.f32 %v1195_v17, %v2806_v8 }
 0x91d   :  { %v2022_v55 = vpop.f32.mrf.mxu1 }
 0x91e   :  { %v1189_v56 = vadd.f32 %v2022_v55, %v1099_v45  ;;  %v1196_v22 = vmax.f32 %v1168_v9, 0.0  ;;  %v1206_v20 = vadd.f32 %v1198_v59, %v2787_v0  ;;  %v3075_v31 = vmax.f32 %v1203_v28, 0.0 }
 0x91f   :  { %v1180_v63 = vpop.f32.mrf.mxu1 }
 0x920   :  { %v1201_v10 = vmax.f32 %v1189_v56, 0.0  ;;  %v1181_v13 = vadd.f32 %v1180_v63, %v1089_v47  ;;  %v1204_v24 = vadd.f32 %v1196_v22, %v2799_v5  ;;  %v3056_v29 = vmax.f32 %v1206_v20, 0.0 }
 0x921   :  { %v2023_v62 = vpop.f32.mrf.mxu1  ;;  %v3066_v5 = vmax.f32 %v1205_v19, 0.0 }
 0x922   :  { %v1199_v18 = vmax.f32 %v1181_v13, 0.0  ;;  %v1192_v6 = vadd.f32 %v2023_v62, %v1104_v43  ;;  %v1209_v48 = vadd.f32 %v1201_v10, %v2783_v60  ;;  %v3068_v30 = vmax.f32 %v1204_v24, 0.0 }
 0x923   :  { %v1183_v15 = vpop.f32.mrf.mxu1  ;;  %v2299_v32 = vpack.i.bf16 %v3056_v29, %v3066_v5  ;;  %v1323_v33 = vpack.c.bf16 %v3056_v29, %v3066_v5 }
 0x924   :  { %v1202_v11 = vmax.f32 %v1192_v6, 0.0  ;;  %v1184_v12 = vadd.f32 %v1183_v15, %v1094_v46  ;;  %v1207_v21 = vadd.f32 %v1199_v18, %v2789_v1  ;;  %v3050_v26 = vmax.f32 %v1209_v48, 0.0 }
 0x925   :  { %v2304_v34 = vpack.i.bf16 %v3068_v30, %v3075_v31  ;;  %v1322_v35 = vpack.c.bf16 %v3068_v30, %v3075_v31 }
 0x926   :  { %v1210_v23 = vadd.f32 %v1202_v11, %v2785_v61  ;;  %v1200_v25 = vmax.f32 %v1184_v12, 0.0  ;;  %v3058_v0 = vmax.f32 %v1207_v21, 0.0 }
 0x928   :  { %v3052_v27 = vmax.f32 %v1210_v23, 0.0  ;;  %v1208_v60 = vadd.f32 %v1200_v25, %v2791_v2 }
 0x92a   :  { %v3060_v1 = vmax.f32 %v1208_v60, 0.0  ;;  %v2289_v61 = vpack.i.bf16 %v3052_v27, %v3050_v26  ;;  %v1325_v4 = vpack.c.bf16 %v3052_v27, %v3050_v26 }
 0x92c   :  { %2290 = vrot.lane.b32.xlu1 %v2289_v61, %s2437_s26  ;;  %2024 = vmatprep.subr.bf16.mxu0 %v1325_v4  ;;  %v2294_v2 = vpack.i.bf16 %v3060_v1, %v3058_v0  ;;  %v1324_v8 = vpack.c.bf16 %v3060_v1, %v3058_v0 }
 0x92d   :  { %2025 = vmatpush3.bf16.msra.mxu0 %v1325_v4  ;;  %v1332_v4 = vld [vmem:[%s3358_s12 + $0x30] sm:$0xff] }
 0x92e   :  { %2295 = vrot.lane.b32.xlu0 %v2294_v2, %s2437_s26  ;;  %2026 = vmatprep.subr.bf16.mxu0 %v1324_v8  ;;  %v2429_v2 = vld [vmem:[%s3359_s11] sm:$0xff]  }
 0x92f   :  { %2040 = vmatprep.mubr.bf16.mxu0 %v2429_v2 }
 0x930   :  { %2300 = vrot.lane.b32.xlu1 %v2299_v32, %s2437_s26  ;;  %v1330_v32 = vld [vmem:[%s3358_s12 + $0x20] sm:$0xff] }
 0x931   :  { %2027 = vmatpush3.bf16.msra.mxu0 %v1324_v8  ;;  %v1333_v8 = vld [vmem:[%s3358_s12 + $0x38] sm:$0xff] }
 0x932   :  { %2028 = vmatprep.subr.bf16.mxu0 %v1323_v33  ;;  %2305 = vrot.lane.b32.xlu0 %v2304_v34, %s2437_s26  ;;  %v1328_v34 = vld [vmem:[%s3358_s12 + $0x10] sm:$0xff] }
 0x935   :  { %2029 = vmatpush3.bf16.msra.mxu0 %v1323_v33  ;;  %v1331_v33 = vld [vmem:[%s3358_s12 + $0x28] sm:$0xff] }
 0x936   :  { %2030 = vmatprep.subr.bf16.mxu0 %v1322_v35 }
 0x939   :  { %2031 = vmatpush3.bf16.msra.mxu0 %v1322_v35  ;;  %v1329_v35 = vld [vmem:[%s3358_s12 + $0x18] sm:$0xff] }
 0x99e   :  { %v2291_v36 = vpop.permute.xlu1 %2290 }
 0x99f   :  { %v2293_v37 = vunpack.i.h.bf16 %v2291_v36  ;;  %v2292_v38 = vunpack.i.l.bf16 %v2291_v36  ;;  %v1326_v36 = vld [vmem:[%s3358_s12] sm:$0xff] }
 0x9a0   :  { %v2296_v39 = vpop.permute.xlu0 %2295 }
 0x9a1   :  { %v2298_v40 = vunpack.i.h.bf16 %v2296_v39  ;;  %v2297_v41 = vunpack.i.l.bf16 %v2296_v39  ;;  %v1239_v42 = vsel %vm69_vm0, %v2292_v38, %v3050_v26  ;;  %v1242_v43 = vsel %vm69_vm0, %v2293_v37, %v3052_v27  ;;  %v1327_v37 = vld [vmem:[%s3358_s12 + $0x8] sm:$0xff] }
 0x9a2   :  { %v2301_v45 = vpop.permute.xlu1 %2300  ;;  %v2309_v46 = vpack.i.bf16 %v1242_v43, %v1239_v42 }
 0x9a3   :  { %v2303_v47 = vunpack.i.h.bf16 %v2301_v45  ;;  %v2302_v49 = vunpack.i.l.bf16 %v2301_v45  ;;  %v1233_v50 = vsel %vm69_vm0, %v2297_v41, %v3058_v0  ;;  %v1236_v51 = vsel %vm69_vm0, %v2298_v40, %v3060_v1 }
 0x9a4   :  { %2310 = vrot.lane.b32.xlu1 %v2309_v46, %s2437_s26  ;;  %v2306_v16 = vpop.permute.xlu0 %2305  ;;  %v2314_v52 = vpack.i.bf16 %v1236_v51, %v1233_v50 }
 0x9a5   :  { %v2308_v53 = vunpack.i.h.bf16 %v2306_v16  ;;  %v2307_v54 = vunpack.i.l.bf16 %v2306_v16  ;;  %v1227_v55 = vsel %vm69_vm0, %v2302_v49, %v3066_v5  ;;  %v1230_v56 = vsel %vm69_vm0, %v2303_v47, %v3056_v29 }
 0x9a6   :  { %2315 = vrot.lane.b32.xlu0 %v2314_v52, %s2437_s26  ;;  %v2319_v57 = vpack.i.bf16 %v1230_v56, %v1227_v55  ;;  %v2430_v55 = vld [vmem:[%s3359_s11 + $0x8] sm:$0xff]   ;;  %v2431_v56 = vld [vmem:[%s3359_s11 + $0x10] sm:$0xff]  }
 0x9a7   :  { %v1221_v58 = vsel %vm69_vm0, %v2307_v54, %v3075_v31  ;;  %v1224_v63 = vsel %vm69_vm0, %v2308_v53, %v3068_v30 }
 0x9a8   :  { %2320 = vrot.lane.b32.xlu1 %v2319_v57, %s2437_s26  ;;  %v2324_v3 = vpack.i.bf16 %v1224_v63, %v1221_v58  ;;  %v2432_v57 = vld [vmem:[%s3359_s11 + $0x18] sm:$0xff]  }
 0x9aa   :  { %2325 = vrot.lane.b32.xlu0 %v2324_v3, %s2437_s26 }
 0xa16   :  { %v2311_v9 = vpop.permute.xlu1 %2310 }
 0xa17   :  { %v2313_v10 = vunpack.i.h.bf16 %v2311_v9  ;;  %v2312_v13 = vunpack.i.l.bf16 %v2311_v9 }
 0xa18   :  { %v2316_v14 = vpop.permute.xlu0 %2315 }
 0xa19   :  { %v2318_v59 = vunpack.i.h.bf16 %v2316_v14  ;;  %v2317_v62 = vunpack.i.l.bf16 %v2316_v14  ;;  %v1265_v18 = vsel %vm69_vm0, %v2312_v13, %v3050_v26  ;;  %v1266_v6 = vsel %vm69_vm0, %v2313_v10, %v3052_v27 }
 0xa1a   :  { %v2321_v7 = vpop.permute.xlu1 %2320  ;;  %v2329_v15 = vpack.i.bf16 %v1266_v6, %v1265_v18 }
 0xa1b   :  { %v2323_v22 = vunpack.i.h.bf16 %v2321_v7  ;;  %v2322_v48 = vunpack.i.l.bf16 %v2321_v7  ;;  %v1263_v11 = vsel %vm69_vm0, %v2317_v62, %v3058_v0  ;;  %v1264_v12 = vsel %vm69_vm0, %v2318_v59, %v3060_v1 }
 0xa1c   :  { %2330 = vrot.lane.b32.xlu1 %v2329_v15, %s2441_s9  ;;  %v2326_v17 = vpop.permute.xlu0 %2325  ;;  %v2334_v20 = vpack.i.bf16 %v1264_v12, %v1263_v11 }
 0xa1d   :  { %v2328_v21 = vunpack.i.h.bf16 %v2326_v17  ;;  %v2327_v23 = vunpack.i.l.bf16 %v2326_v17  ;;  %v1261_v25 = vsel %vm69_vm0, %v2322_v48, %v3066_v5  ;;  %v1262_v19 = vsel %vm69_vm0, %v2323_v22, %v3056_v29 }
 0xa1e   :  { %2335 = vrot.lane.b32.xlu0 %v2334_v20, %s2441_s9  ;;  %v2339_v24 = vpack.i.bf16 %v1262_v19, %v1261_v25 }
 0xa1f   :  { %v1259_v60 = vsel %vm69_vm0, %v2327_v23, %v3075_v31  ;;  %v1260_v28 = vsel %vm69_vm0, %v2328_v21, %v3068_v30 }
 0xa20   :  { %2340 = vrot.lane.b32.xlu1 %v2339_v24, %s2441_s9  ;;  %v2344_v61 = vpack.i.bf16 %v1260_v28, %v1259_v60 }
 0xa22   :  { %2345 = vrot.lane.b32.xlu0 %v2344_v61, %s2441_s9 }
 0xa24   :  { %1366 = vperm.xlu1 %2108, %v1332_v4  }
 0xa26   :  { %1371 = vperm.xlu0 %2107, %v1333_v8  }
 0xa28   :  { %1356 = vperm.xlu1 %2108, %v1330_v32  }
 0xa2a   :  { %1361 = vperm.xlu0 %2107, %v1331_v33  }
 0xa2c   :  { %1346 = vperm.xlu1 %2108, %v1328_v34  }
 0xa2e   :  { %1351 = vperm.xlu0 %2107, %v1329_v35  }
 0xa30   :  { %1336 = vperm.xlu1 %2108, %v1326_v36  }
 0xa32   :  { %1341 = vperm.xlu0 %2107, %v1327_v37  }
 0xa8e   :  { %v2331_v38 = vpop.permute.xlu1 %2330 }
 0xa8f   :  { %v2333_v39 = vunpack.i.h.bf16 %v2331_v38  ;;  %v2332_v40 = vunpack.i.l.bf16 %v2331_v38 }
 0xa90   :  { %v2336_v42 = vpop.permute.xlu0 %2335 }
 0xa91   :  { %v1823_v43 = vpack.c.bf16 %v2333_v39, %v2332_v40  ;;  %v2338_v45 = vunpack.i.h.bf16 %v2336_v42  ;;  %v2337_v46 = vunpack.i.l.bf16 %v2336_v42 }
 0xa92   :  { %v2341_v47 = vpop.permute.xlu1 %2340 }
 0xa93   :  { %v1826_v49 = vpack.c.bf16 %v2338_v45, %v2337_v46  ;;  %v2343_v50 = vunpack.i.h.bf16 %v2341_v47  ;;  %v2342_v51 = vunpack.i.l.bf16 %v2341_v47  ;;  %2032 = vmatprep.subr.msk.bf16.mxu0 %vm3156_vm8, %v1823_v43 }
 0xa94   :  { %v2346_v16 = vpop.permute.xlu0 %2345  ;;  %2033 = vmatpush3.bf16.msk.msra.mxu0 %vm3156_vm8, %v1823_v43 }
 0xa95   :  { %2034 = vmatprep.subr.msk.bf16.mxu0 %vm3156_vm8, %v1826_v49  ;;  %v1829_v44 = vpack.c.bf16 %v2343_v50, %v2342_v51  ;;  %v2348_v52 = vunpack.i.h.bf16 %v2346_v16  ;;  %v2347_v53 = vunpack.i.l.bf16 %v2346_v16 }
 0xa97   :  { %v1832_v54 = vpack.c.bf16 %v2348_v52, %v2347_v53 }
 0xa98   :  { %2035 = vmatpush3.bf16.msk.msra.mxu0 %vm3156_vm8, %v1826_v49 }
 0xa99   :  { %2036 = vmatprep.subr.msk.bf16.mxu0 %vm3156_vm8, %v1829_v44 }
 0xa9c   :  { %2037 = vmatpush3.bf16.msk.msra.mxu0 %vm3156_vm8, %v1829_v44 }
 0xa9d   :  { %2038 = vmatprep.subr.msk.bf16.mxu0 %vm3156_vm8, %v1832_v54 }
 0xa9f   :  { %v1367_v63 = vpop.permute.xlu1 %1366 }
 0xaa0   :  { %2039 = vmatpush3.bf16.msk.msra.mxu0 %vm3156_vm8, %v1832_v54 }
 0xaa1   :  { %v1372_v58 = vpop.permute.xlu0 %1371 }
 0xaa3   :  { %2041 = vmatmul.mubr.bf16.vlgmr.msra.gmra.mxu0 %v2430_v55  ;;  %v1357_v13 = vpop.permute.xlu1 %1356 }
 0xaa4   :  { %2044 = vmatprep.mubr.bf16.mxu0 %v2431_v56 }
 0xaa5   :  { %v1362_v9 = vpop.permute.xlu0 %1361 }
 0xaa7   :  { %v1347_v6 = vpop.permute.xlu1 %1346 }
 0xaa9   :  { %v1352_v62 = vpop.permute.xlu0 %1351 }
 0xaab   :  { %2045 = vmatmul.mubr.bf16.gmra.mxu0 %v2432_v57  ;;  %v1337_v23 = vpop.permute.xlu1 %1336 }
 0xaad   :  { %v1342_v17 = vpop.permute.xlu0 %1341 }
 0xb63   :  { %v2042_v3 = vpop.f32.mrf.mxu0 }
 0xb64   :  { %v1441_v20 = vadd.f32 %v2042_v3, %v1347_v6 }
 0xb65   :  { %v1432_v10 = vpop.f32.mrf.mxu0 }
 0xb66   :  { %v1433_v28 = vadd.f32 %v1432_v10, %v1337_v23  ;;  %v3195_v33 = vmax.f32 %v1441_v20, 0.0 }
 0xb67   :  { %v2043_v14 = vpop.f32.mrf.mxu0 }
 0xb68   :  { %v1444_v22 = vadd.f32 %v2043_v14, %v1352_v62  ;;  %v3204_v37 = vmax.f32 %v1433_v28, 0.0 }
 0xb69   :  { %v1435_v59 = vpop.f32.mrf.mxu0 }
 0xb6a   :  { %v1436_v25 = vadd.f32 %v1435_v59, %v1342_v17  ;;  %v3187_v61 = vmax.f32 %v1444_v22, 0.0 }
 0xb6b   :  { %v2046_v18 = vpop.f32.mrf.mxu0 }
 0xb6c   :  { %v1457_v15 = vadd.f32 %v2046_v18, %v1367_v63  ;;  %v3197_v34 = vmax.f32 %v1436_v25, 0.0  ;;  %v2359_v38 = vpack.i.bf16 %v3187_v61, %v3195_v33  ;;  %v1572_v39 = vpack.c.bf16 %v3187_v61, %v3195_v33 }
 0xb6d   :  { %v1448_v7 = vpop.f32.mrf.mxu0 }
 0xb6e   :  { %v1449_v11 = vadd.f32 %v1448_v7, %v1357_v13  ;;  %v3185_v19 = vmax.f32 %v1457_v15, 0.0  ;;  %v2364_v40 = vpack.i.bf16 %v3197_v34, %v3204_v37  ;;  %v1571_v42 = vpack.c.bf16 %v3197_v34, %v3204_v37 }
 0xb6f   :  { %v2047_v48 = vpop.f32.mrf.mxu0 }
 0xb70   :  { %v1460_v12 = vadd.f32 %v2047_v48, %v1372_v58  ;;  %v3189_v4 = vmax.f32 %v1449_v11, 0.0 }
 0xb71   :  { %v1451_v21 = vpop.f32.mrf.mxu0 }
 0xb72   :  { %v1470_v24 = vmax.f32 %v1460_v12, 0.0  ;;  %v1452_v60 = vadd.f32 %v1451_v21, %v1362_v9 }
 0xb74   :  { %v3191_v2 = vmax.f32 %v1452_v60, 0.0  ;;  %v2349_v8 = vpack.i.bf16 %v1470_v24, %v3185_v19  ;;  %v1574_v32 = vpack.c.bf16 %v1470_v24, %v3185_v19 }
 0xb76   :  { %2350 = vrot.lane.b32.xlu1 %v2349_v8, %s2437_s26  ;;  %2048 = vmatprep.subr.bf16.mxu1 %v1574_v32  ;;  %v2354_v35 = vpack.i.bf16 %v3191_v2, %v3189_v4  ;;  %v1573_v36 = vpack.c.bf16 %v3191_v2, %v3189_v4 }
 0xb77   :  { %2049 = vmatpush3.bf16.msra.mxu1 %v1574_v32 }
 0xb78   :  { %2355 = vrot.lane.b32.xlu0 %v2354_v35, %s2437_s26  ;;  %2050 = vmatprep.subr.bf16.mxu1 %v1573_v36 }
 0xb7a   :  { %2360 = vrot.lane.b32.xlu1 %v2359_v38, %s2437_s26 }
 0xb7b   :  { %2051 = vmatpush3.bf16.msra.mxu1 %v1573_v36 }
 0xb7c   :  { %2052 = vmatprep.subr.bf16.mxu1 %v1572_v39  ;;  %2365 = vrot.lane.b32.xlu0 %v2364_v40, %s2437_s26  ;;  %v1579_v40 = vld [vmem:[%s3360_s14 + $0x20] sm:$0xff] }
 0xb7f   :  { %2053 = vmatpush3.bf16.msra.mxu1 %v1572_v39  ;;  %v1578_v39 = vld [vmem:[%s3360_s14 + $0x18] sm:$0xff] }
 0xb80   :  { %2054 = vmatprep.subr.bf16.mxu1 %v1571_v42 }
 0xb83   :  { %2055 = vmatpush3.bf16.msra.mxu1 %v1571_v42  ;;  %v1580_v42 = vld [vmem:[%s3360_s14 + $0x28] sm:$0xff] }
 0xbe8   :  { %v2351_v43 = vpop.permute.xlu1 %2350 }
 0xbe9   :  { %v2353_v45 = vunpack.i.h.bf16 %v2351_v43  ;;  %v2352_v46 = vunpack.i.l.bf16 %v2351_v43  ;;  %v1581_v43 = vld [vmem:[%s3360_s14 + $0x30] sm:$0xff] }
 0xbea   :  { %v2356_v47 = vpop.permute.xlu0 %2355 }
 0xbeb   :  { %v1494_v49 = vsel %vm69_vm0, %v2353_v45, %v1470_v24  ;;  %v1491_v50 = vsel %vm69_vm0, %v2352_v46, %v3185_v19  ;;  %v2358_v51 = vunpack.i.h.bf16 %v2356_v47  ;;  %v2357_v16 = vunpack.i.l.bf16 %v2356_v47  ;;  %v1582_v45 = vld [vmem:[%s3360_s14 + $0x38] sm:$0xff] }
 0xbec   :  { %v2369_v44 = vpack.i.bf16 %v1494_v49, %v1491_v50  ;;  %v2361_v52 = vpop.permute.xlu1 %2360 }
 0xbed   :  { %v1488_v53 = vsel %vm69_vm0, %v2358_v51, %v3191_v2  ;;  %v1485_v54 = vsel %vm69_vm0, %v2357_v16, %v3189_v4  ;;  %v2363_v55 = vunpack.i.h.bf16 %v2361_v52  ;;  %v2362_v56 = vunpack.i.l.bf16 %v2361_v52 }
 0xbee   :  { %v2374_v57 = vpack.i.bf16 %v1488_v53, %v1485_v54  ;;  %2370 = vrot.lane.b32.xlu1 %v2369_v44, %s2437_s26  ;;  %v2366_v58 = vpop.permute.xlu0 %2365 }
 0xbef   :  { %v1482_v63 = vsel %vm69_vm0, %v2363_v55, %v3187_v61  ;;  %v1479_v3 = vsel %vm69_vm0, %v2362_v56, %v3195_v33  ;;  %v2368_v9 = vunpack.i.h.bf16 %v2366_v58  ;;  %v2367_v10 = vunpack.i.l.bf16 %v2366_v58 }
 0xbf0   :  { %v2379_v13 = vpack.i.bf16 %v1482_v63, %v1479_v3  ;;  %2375 = vrot.lane.b32.xlu0 %v2374_v57, %s2437_s26 }
 0xbf1   :  { %v1476_v14 = vsel %vm69_vm0, %v2368_v9, %v3197_v34  ;;  %v1473_v59 = vsel %vm69_vm0, %v2367_v10, %v3204_v37  ;;  %v2434_v9 = vld [vmem:[%s3361_s13 + $0x8] sm:$0xff]   ;;  %v2435_v10 = vld [vmem:[%s3361_s13 + $0x10] sm:$0xff]  }
 0xbf2   :  { %v2384_v62 = vpack.i.bf16 %v1476_v14, %v1473_v59  ;;  %2380 = vrot.lane.b32.xlu1 %v2379_v13, %s2437_s26  ;;  %v2436_v13 = vld [vmem:[%s3361_s13 + $0x18] sm:$0xff]  }
 0xbf4   :  { %2385 = vrot.lane.b32.xlu0 %v2384_v62, %s2437_s26 }
 0xc60   :  { %v2371_v18 = vpop.permute.xlu1 %2370 }
 0xc61   :  { %v2373_v6 = vunpack.i.h.bf16 %v2371_v18  ;;  %v2372_v7 = vunpack.i.l.bf16 %v2371_v18 }
 0xc62   :  { %v2376_v15 = vpop.permute.xlu0 %2375 }
 0xc63   :  { %v1518_v22 = vsel %vm69_vm0, %v2373_v6, %v1470_v24  ;;  %v1517_v48 = vsel %vm69_vm0, %v2372_v7, %v3185_v19  ;;  %v2378_v11 = vunpack.i.h.bf16 %v2376_v15  ;;  %v2377_v12 = vunpack.i.l.bf16 %v2376_v15 }
 0xc64   :  { %v2389_v17 = vpack.i.bf16 %v1518_v22, %v1517_v48  ;;  %v2381_v20 = vpop.permute.xlu1 %2380 }
 0xc65   :  { %v1516_v21 = vsel %vm69_vm0, %v2378_v11, %v3191_v2  ;;  %v1515_v23 = vsel %vm69_vm0, %v2377_v12, %v3189_v4  ;;  %v2383_v25 = vunpack.i.h.bf16 %v2381_v20  ;;  %v2382_v60 = vunpack.i.l.bf16 %v2381_v20 }
 0xc66   :  { %v2394_v28 = vpack.i.bf16 %v1516_v21, %v1515_v23  ;;  %2390 = vrot.lane.b32.xlu1 %v2389_v17, %s2441_s9  ;;  %v2386_v8 = vpop.permute.xlu0 %2385 }
 0xc67   :  { %v1514_v24 = vsel %vm69_vm0, %v2383_v25, %v3187_v61  ;;  %v1513_v19 = vsel %vm69_vm0, %v2382_v60, %v3195_v33  ;;  %v2388_v32 = vunpack.i.h.bf16 %v2386_v8  ;;  %v2387_v35 = vunpack.i.l.bf16 %v2386_v8  ;;  %v1575_v61 = vld [vmem:[%s3360_s14] sm:$0xff] }
 0xc68   :  { %v2399_v36 = vpack.i.bf16 %v1514_v24, %v1513_v19  ;;  %2395 = vrot.lane.b32.xlu0 %v2394_v28, %s2441_s9  ;;  %v2433_v33 = vld [vmem:[%s3361_s13] sm:$0xff]  }
 0xc69   :  { %v1512_v4 = vsel %vm69_vm0, %v2388_v32, %v3197_v34  ;;  %v1511_v2 = vsel %vm69_vm0, %v2387_v35, %v3204_v37  ;;  %v1576_v34 = vld [vmem:[%s3360_s14 + $0x8] sm:$0xff]  ;;  %2064 = vmatprep.mubr.bf16.mxu1 %v2433_v33  ;;  %v1577_v37 = vld [vmem:[%s3360_s14 + $0x10] sm:$0xff] }
 0xc6a   :  { %v2404_v38 = vpack.i.bf16 %v1512_v4, %v1511_v2  ;;  %2400 = vrot.lane.b32.xlu1 %v2399_v36, %s2441_s9 }
 0xc6c   :  { %2405 = vrot.lane.b32.xlu0 %v2404_v38, %s2441_s9 }
 0xc6e   :  { %1585 = vperm.xlu1 %2108, %v1575_v61  }
 0xc70   :  { %1590 = vperm.xlu0 %2107, %v1576_v34  }
 0xc72   :  { %1595 = vperm.xlu1 %2108, %v1577_v37  }
 0xc74   :  { %1600 = vperm.xlu0 %2107, %v1578_v39  }
 0xc76   :  { %1605 = vperm.xlu1 %2108, %v1579_v40  }
 0xc78   :  { %1610 = vperm.xlu0 %2107, %v1580_v42  }
 0xc7a   :  { %1615 = vperm.xlu1 %2108, %v1581_v43  }
 0xc7c   :  { %1620 = vperm.xlu0 %2107, %v1582_v45  }
 0xcd8   :  { %v2391_v46 = vpop.permute.xlu1 %2390 }
 0xcd9   :  { %v2393_v47 = vunpack.i.h.bf16 %v2391_v46  ;;  %v2392_v49 = vunpack.i.l.bf16 %v2391_v46 }
 0xcda   :  { %v2396_v50 = vpop.permute.xlu0 %2395 }
 0xcdb   :  { %v1839_v51 = vpack.c.bf16 %v2393_v47, %v2392_v49  ;;  %v2398_v16 = vunpack.i.h.bf16 %v2396_v50  ;;  %v2397_v44 = vunpack.i.l.bf16 %v2396_v50 }
 0xcdc   :  { %v2401_v52 = vpop.permute.xlu1 %2400 }
 0xcdd   :  { %v1842_v53 = vpack.c.bf16 %v2398_v16, %v2397_v44  ;;  %v2403_v54 = vunpack.i.h.bf16 %v2401_v52  ;;  %v2402_v55 = vunpack.i.l.bf16 %v2401_v52  ;;  %2056 = vmatprep.subr.msk.bf16.mxu1 %vm3156_vm8, %v1839_v51 }
 0xcde   :  { %v2406_v56 = vpop.permute.xlu0 %2405  ;;  %2057 = vmatpush3.bf16.msk.msra.mxu1 %vm3156_vm8, %v1839_v51 }
 0xcdf   :  { %2058 = vmatprep.subr.msk.bf16.mxu1 %vm3156_vm8, %v1842_v53  ;;  %v1845_v57 = vpack.c.bf16 %v2403_v54, %v2402_v55  ;;  %v2408_v58 = vunpack.i.h.bf16 %v2406_v56  ;;  %v2407_v63 = vunpack.i.l.bf16 %v2406_v56 }
 0xce1   :  { %v1848_v3 = vpack.c.bf16 %v2408_v58, %v2407_v63 }
 0xce2   :  { %2059 = vmatpush3.bf16.msk.msra.mxu1 %vm3156_vm8, %v1842_v53 }
 0xce3   :  { %2060 = vmatprep.subr.msk.bf16.mxu1 %vm3156_vm8, %v1845_v57 }
 0xce6   :  { %2061 = vmatpush3.bf16.msk.msra.mxu1 %vm3156_vm8, %v1845_v57 }
 0xce7   :  { %2062 = vmatprep.subr.msk.bf16.mxu1 %vm3156_vm8, %v1848_v3 }
 0xce9   :  { %v1586_v14 = vpop.permute.xlu1 %1585 }
 0xcea   :  { %2063 = vmatpush3.bf16.msk.msra.mxu1 %vm3156_vm8, %v1848_v3 }
 0xceb   :  { %v1591_v59 = vpop.permute.xlu0 %1590 }
 0xced   :  { %2065 = vmatmul.mubr.bf16.vlgmr.msra.gmra.mxu1 %v2434_v9  ;;  %v1596_v62 = vpop.permute.xlu1 %1595 }
 0xcee   :  { %2068 = vmatprep.mubr.bf16.mxu1 %v2435_v10 }
 0xcef   :  { %v1601_v18 = vpop.permute.xlu0 %1600 }
 0xcf1   :  { %v1606_v15 = vpop.permute.xlu1 %1605 }
 0xcf3   :  { %v1611_v21 = vpop.permute.xlu0 %1610 }
 0xcf5   :  { %2069 = vmatmul.mubr.bf16.gmra.mxu1 %v2436_v13  ;;  %v1616_v24 = vpop.permute.xlu1 %1615 }
 0xcf7   :  { %v1621_v33 = vpop.permute.xlu0 %1620 }
 0xdad   :  { %v2066_v6 = vpop.f32.mrf.mxu1 }
 0xdae   :  { %v1690_v7 = vadd.f32 %v2066_v6, %v1596_v62 }
 0xdaf   :  { %v1681_v41 = vpop.f32.mrf.mxu1 }
 0xdb0   :  { %v1714_v22 = vmax.f32 %v1690_v7, 0.0  ;;  %v1682_v48 = vadd.f32 %v1681_v41, %v1586_v14 }
 0xdb1   :  { %v2067_v11 = vpop.f32.mrf.mxu1 }
 0xdb2   :  { %v1722_v12 = vadd.f32 %v1714_v22, %v3066_v5  ;;  %v1712_v17 = vmax.f32 %v1682_v48, 0.0  ;;  %v1693_v20 = vadd.f32 %v2067_v11, %v1601_v18 }
 0xdb3   :  { %v1684_v23 = vpop.f32.mrf.mxu1 }
 0xdb4   :  { %v1730_v25 = vmax.f32 %v1722_v12, 0.0  ;;  %v1720_v60 = vadd.f32 %v1712_v17, %v3075_v31  ;;  %v1715_v28 = vmax.f32 %v1693_v20, 0.0  ;;  %v1685_v8 = vadd.f32 %v1684_v23, %v1591_v59 }
 0xdb5   :  { %v2070_v19 = vpop.f32.mrf.mxu1 }
 0xdb6   :  { %1738 = vst.msk [vmem:[%s3362_s15 + $0x10] sm:$0xff] %vm608_vm4, %v1730_v25  ;;  %v1728_v32 = vmax.f32 %v1720_v60, 0.0  ;;  %v1723_v35 = vadd.f32 %v1715_v28, %v3056_v29  ;;  %v1713_v5 = vmax.f32 %v1685_v8, 0.0  ;;  %v1706_v36 = vadd.f32 %v2070_v19, %v1616_v24 }
 0xdb7   :  { %v1697_v4 = vpop.f32.mrf.mxu1 }
 0xdb8   :  { %1736 = vst.msk [vmem:[%s3362_s15] sm:$0xff] %vm608_vm4, %v1728_v32  ;;  %v1731_v31 = vmax.f32 %v1723_v35, 0.0  ;;  %v1721_v2 = vadd.f32 %v1713_v5, %v3068_v30  ;;  %v1718_v38 = vmax.f32 %v1706_v36, 0.0  ;;  %v1698_v61 = vadd.f32 %v1697_v4, %v1606_v15 }
 0xdb9   :  { %v2071_v34 = vpop.f32.mrf.mxu1 }
 0xdba   :  { %1739 = vst.msk [vmem:[%s3362_s15 + $0x18] sm:$0xff] %vm608_vm4, %v1731_v31  ;;  %v1729_v29 = vmax.f32 %v1721_v2, 0.0  ;;  %v1726_v37 = vadd.f32 %v1718_v38, %v3050_v26  ;;  %v1716_v39 = vmax.f32 %v1698_v61, 0.0  ;;  %v1709_v40 = vadd.f32 %v2071_v34, %v1621_v33 }
 0xdbb   :  { %v1700_v42 = vpop.f32.mrf.mxu1 }
 0xdbc   :  { %1737 = vst.msk [vmem:[%s3362_s15 + $0x8] sm:$0xff] %vm608_vm4, %v1729_v29  ;;  %v1734_v30 = vmax.f32 %v1726_v37, 0.0  ;;  %v1724_v43 = vadd.f32 %v1716_v39, %v3058_v0  ;;  %v1719_v45 = vmax.f32 %v1709_v40, 0.0  ;;  %v1701_v46 = vadd.f32 %v1700_v42, %v1611_v21 }
 0xdbe   :  { %1742 = vst.msk [vmem:[%s3362_s15 + $0x30] sm:$0xff] %vm608_vm4, %v1734_v30  ;;  %v1732_v47 = vmax.f32 %v1724_v43, 0.0  ;;  %v1727_v26 = vadd.f32 %v1719_v45, %v3052_v27  ;;  %v1717_v49 = vmax.f32 %v1701_v46, 0.0 }
 0xdc0   :  { %1740 = vst.msk [vmem:[%s3362_s15 + $0x20] sm:$0xff] %vm608_vm4, %v1732_v47  ;;  %v1735_v50 = vmax.f32 %v1727_v26, 0.0  ;;  %v1725_v51 = vadd.f32 %v1717_v49, %v3060_v1 }
 0xdc2   :  { %1743 = vst.msk [vmem:[%s3362_s15 + $0x38] sm:$0xff] %vm608_vm4, %v1735_v50  ;;  %v1733_v0 = vmax.f32 %v1725_v51, 0.0 }
 0xdc4   :  { %1741 = vst.msk [vmem:[%s3362_s15 + $0x28] sm:$0xff] %vm608_vm4, %v1733_v0 }

</bundles_post_ra>
